<compile_context>
chip_gen: v7x
topology: tpu7x:2x2x1
jax: 0.10.0
libtpu: 0.0.40
codegen_flags: <defaults>
</compile_context>

<pallas_src>
import math
from functools import partial

import jax
import jax.numpy as jnp
from jax.experimental import pallas as pl
from jax.experimental.pallas import tpu as pltpu


_VMEM_LIMIT = 64 * 1024 * 1024   # explicit scoped-VMEM budget (<= v7x physical)
_MASK_VALUE = -1e30              # large-negative fill for masked logits


def _pick_row_tile(n, max_tile=256):
    """Row tile: full extent if small, else a sublane-aligned cap."""
    if n <= max_tile:
        return n
    return max_tile  # multiple of 8


# ----------------- fused Q/K/V projection + head split -----------------
# x:(B,L,Dm) @ W:(H,Dm,E) + b:(H,1,E)  ->  (B,H,L,E)   (head-major directly)

def _head_proj_kernel(x_ref, w_ref, b_ref, o_ref, *, compute_dtype):
    x = x_ref[...].astype(compute_dtype)          # (TL, Dm)
    w = w_ref[...].astype(compute_dtype)          # (Dm, E)
    y = jnp.dot(x, w, preferred_element_type=jnp.float32)
    o_ref[...] = (y + b_ref[...].astype(jnp.float32)).astype(o_ref.dtype)


def pallas_head_projection(x, w, b, *, row_tile=256, compute_dtype=jnp.float32):
    B, L, Dm = x.shape
    H, _, E = w.shape
    tl = _pick_row_tile(L, row_tile)
    grid = (B, pl.cdiv(L, tl), H)   # H innermost: x tile stays VMEM-resident across heads

    flops = 2 * B * L * Dm * H * E
    bytes_accessed = 4 * (B * L * Dm + H * Dm * E + H * E + B * H * L * E)

    return pl.pallas_call(
        partial(_head_proj_kernel, compute_dtype=compute_dtype),
        out_shape=jax.ShapeDtypeStruct((B, H, L, E), x.dtype),
        grid=grid,
        in_specs=[pl.BlockSpec((None, tl, Dm), lambda bi, i, h: (bi, i, 0)),
                  pl.BlockSpec((None, Dm, E), lambda bi, i, h: (h, 0, 0)),
                  pl.BlockSpec((None, 1, E), lambda bi, i, h: (h, 0, 0))],
        out_specs=pl.BlockSpec((None, None, tl, E), lambda bi, i, h: (bi, h, i, 0)),
        compiler_params=pltpu.CompilerParams(
            dimension_semantics=("parallel", "parallel", "arbitrary"),
            vmem_limit_bytes=_VMEM_LIMIT),
        cost_estimate=pl.CostEstimate(flops=flops, transcendentals=0,
                                      bytes_accessed=bytes_accessed),
    )(x, w, b)


# ------------------------- per-head full attention -------------------------
# grid = (B, H, L_tiles); one (TL x S) score tile per step.

def _attn_kernel(q_ref, k_ref, v_ref, bias_ref, mask_ref, o_ref, a_ref,
                 *, scale, compute_dtype):
    # q:(TL,E) k:(S,E) v:(S,D) bias:(TL,S) mask:(TL,S) float (1.0 = masked)
    q = (q_ref[...] * scale).astype(compute_dtype)     # scale folded into q
    k = k_ref[...].astype(compute_dtype)

    # scores[l,s] = sum_e q[l,e] * k[s,e]  (contract E directly; no K transpose)
    scores = jax.lax.dot_general(
        q, k, dimension_numbers=(((1,), (1,)), ((), ())),
        preferred_element_type=jnp.float32)
    scores = scores + bias_ref[...].astype(jnp.float32)
    scores = jnp.where(mask_ref[...] != 0.0, _MASK_VALUE, scores)  # in-kernel VPU select

    # numerically stable softmax over S
    m = jnp.max(scores, axis=-1, keepdims=True)
    p = jnp.exp(scores - m)
    denom = jnp.sum(p, axis=-1, keepdims=True)
    attn = p / denom            # exact: these probabilities are returned to the caller

    out = jnp.dot(attn.astype(compute_dtype), v_ref[...].astype(compute_dtype),
                  preferred_element_type=jnp.float32)

    o_ref[...] = out.astype(o_ref.dtype)
    a_ref[...] = attn.astype(a_ref.dtype)


def pallas_full_attention(q, k, v, bias, mask, *, row_tile=256,
                          compute_dtype=jnp.float32):
    """q:(B,H,L,E) k:(B,H,S,E) v:(B,H,S,D) bias:(B,H,L,S) mask:(L,S) -> (out, attn)."""
    B, H, L, E = q.shape
    S = k.shape[2]
    D = v.shape[3]
    tl = _pick_row_tile(L, row_tile)
    grid = (B, H, pl.cdiv(L, tl))
    scale = 1.0 / math.sqrt(E)

    flops = 2 * B * H * L * S * (E + D)
    transc = B * H * L * S
    bytes_accessed = 4 * (B * H * L * E + B * H * S * E + B * H * S * D
                          + 2 * B * H * L * S + L * S + B * H * L * D)

    out, attn = pl.pallas_call(
        partial(_attn_kernel, scale=scale, compute_dtype=compute_dtype),
        out_shape=(jax.ShapeDtypeStruct((B, H, L, D), q.dtype),
                   jax.ShapeDtypeStruct((B, H, L, S), jnp.float32)),
        grid=grid,
        in_specs=[pl.BlockSpec((None, None, tl, E), lambda b, h, i: (b, h, i, 0)),
                  pl.BlockSpec((None, None, S, E), lambda b, h, i: (b, h, 0, 0)),
                  pl.BlockSpec((None, None, S, D), lambda b, h, i: (b, h, 0, 0)),
                  pl.BlockSpec((None, None, tl, S), lambda b, h, i: (b, h, i, 0)),
                  pl.BlockSpec((tl, S), lambda b, h, i: (i, 0))],
        out_specs=(pl.BlockSpec((None, None, tl, D), lambda b, h, i: (b, h, i, 0)),
                   pl.BlockSpec((None, None, tl, S), lambda b, h, i: (b, h, i, 0))),
        compiler_params=pltpu.CompilerParams(
            dimension_semantics=("parallel", "parallel", "parallel"),
            vmem_limit_bytes=_VMEM_LIMIT),
        cost_estimate=pl.CostEstimate(flops=flops, transcendentals=transc,
                                      bytes_accessed=bytes_accessed),
    )(q, k, v, bias, mask)
    return out, attn


# ----------------- fused head merge + output projection -----------------
# sum_h xh[b,h,:,:] @ Wo[h] + bo  ->  (B, L, Dm); H is an in-kernel reduction.

def _out_proj_kernel(x_ref, w_ref, b_ref, o_ref, acc_ref, *, compute_dtype):
    h = pl.program_id(2)

    @pl.when(h == 0)
    def _init():
        acc_ref[...] = jnp.zeros_like(acc_ref)

    acc_ref[...] += jnp.dot(x_ref[...].astype(compute_dtype),
                            w_ref[...].astype(compute_dtype),
                            preferred_element_type=jnp.float32)

    @pl.when(h == pl.num_programs(2) - 1)
    def _fin():
        o_ref[...] = (acc_ref[...] + b_ref[...].astype(jnp.float32)).astype(o_ref.dtype)


def pallas_out_projection(xh, w, b, *, row_tile=256, compute_dtype=jnp.float32):
    """xh:(B,H,L,D), w:(H,D,Dm), b:(1,Dm) -> (B,L,Dm)."""
    B, H, L, D = xh.shape
    Dm = w.shape[2]
    tl = _pick_row_tile(L, row_tile)
    grid = (B, pl.cdiv(L, tl), H)   # H last = reduction axis ("arbitrary")

    flops = 2 * B * L * H * D * Dm
    bytes_accessed = 4 * (B * H * L * D + H * D * Dm + Dm + B * L * Dm)

    return pl.pallas_call(
        partial(_out_proj_kernel, compute_dtype=compute_dtype),
        out_shape=jax.ShapeDtypeStruct((B, L, Dm), xh.dtype),
        grid=grid,
        in_specs=[pl.BlockSpec((None, None, tl, D), lambda bi, i, h: (bi, h, i, 0)),
                  pl.BlockSpec((None, D, Dm), lambda bi, i, h: (h, 0, 0)),
                  pl.BlockSpec((1, Dm), lambda bi, i, h: (0, 0))],
        out_specs=pl.BlockSpec((None, tl, Dm), lambda bi, i, h: (bi, i, 0)),
        scratch_shapes=[pltpu.VMEM((tl, Dm), jnp.float32)],
        compiler_params=pltpu.CompilerParams(
            dimension_semantics=("parallel", "parallel", "arbitrary"),
            vmem_limit_bytes=_VMEM_LIMIT),
        cost_estimate=pl.CostEstimate(flops=flops, transcendentals=0,
                                      bytes_accessed=bytes_accessed),
    )(xh, w, b)


# ----------------------------- jitted forward -----------------------------

@partial(jax.jit, static_argnames=("use_bf16",))
def attention_layer_forward(params, queries, keys, values, attn_mask, attn_bias,
                            *, use_bf16=False):
    compute_dtype = jnp.bfloat16 if use_bf16 else jnp.float32

    # Only the tiny (L, S) mask is touched in the wrapper (dtype cast); the
    # (B, H, L, S) bias goes to the kernel untouched and the mask select happens
    # in-kernel -> no extra full-tensor HBM pass.
    mask_f = attn_mask.astype(jnp.float32)

    qh = pallas_head_projection(queries, params["wq"], params["bq"],
                                compute_dtype=compute_dtype)   # (B,H,L,E)
    kh = pallas_head_projection(keys, params["wk"], params["bk"],
                                compute_dtype=compute_dtype)   # (B,H,S,E)
    vh = pallas_head_projection(values, params["wv"], params["bv"],
                                compute_dtype=compute_dtype)   # (B,H,S,D)

    out_h, attn = pallas_full_attention(qh, kh, vh, attn_bias, mask_f,
                                        compute_dtype=compute_dtype)

    final = pallas_out_projection(out_h, params["wo"], params["bo"],
                                  compute_dtype=compute_dtype)  # (B,L,Dm)
    return final, attn


# ----------------------------- module wrapper -----------------------------

class AttentionLayerPallas:
    def __init__(self, d_model, n_heads, key, d_keys=None, d_values=None,
                 use_bf16_matmul=False):
        d_keys = d_keys or d_model // n_heads
        d_values = d_values or d_model // n_heads
        self.n_heads = n_heads
        self.d_keys = d_keys
        self.d_values = d_values
        self.use_bf16 = use_bf16_matmul
        H = n_heads

        ks = jax.random.split(key, 8)

        def init_linear(kw, kb, fan_in, fan_out):
            # PyTorch nn.Linear-style uniform(-1/sqrt(fan_in), 1/sqrt(fan_in)).
            bound = 1.0 / math.sqrt(fan_in)
            w = jax.random.uniform(kw, (fan_out, fan_in), jnp.float32, -bound, bound)
            b = jax.random.uniform(kb, (fan_out,), jnp.float32, -bound, bound)
            return w, b

        wq, bq = init_linear(ks[0], ks[1], d_model, d_keys * H)
        wk, bk = init_linear(ks[2], ks[3], d_model, d_keys * H)
        wv, bv = init_linear(ks[4], ks[5], d_model, d_values * H)
        wo, bo = init_linear(ks[6], ks[7], d_values * H, d_model)

        def to_head_major(w, b, E):
            # (H*E, Dm) PyTorch layout -> (H, Dm, E) so the kernel does x @ W_h.
            Dm = w.shape[1]
            w_h = jnp.transpose(w.reshape(H, E, Dm), (0, 2, 1))
            b_h = b.reshape(H, 1, E)
            return w_h, b_h

        wq_h, bq_h = to_head_major(wq, bq, d_keys)
        wk_h, bk_h = to_head_major(wk, bk, d_keys)
        wv_h, bv_h = to_head_major(wv, bv, d_values)
        wo_h = jnp.transpose(wo, (1, 0)).reshape(H, d_values, d_model)  # (H, D, Dm)
        bo_h = bo.reshape(1, d_model)

        self.params = dict(wq=wq_h, bq=bq_h, wk=wk_h, bk=bk_h,
                           wv=wv_h, bv=bv_h, wo=wo_h, bo=bo_h)

    def __call__(self, queries, keys, values, attn_mask, attn_bias):
        return attention_layer_forward(self.params, queries, keys, values,
                                       attn_mask, attn_bias, use_bf16=self.use_bf16)


# -------------------------- pure-JAX reference --------------------------

def reference_forward(params, queries, keys, values, attn_mask, attn_bias):
    H, Dm, E = params["wq"].shape

    def proj(x, w, b):  # w:(H,Dm,E), b:(H,1,E) -> (B,H,L,E)
        return jnp.einsum("bld,hde->bhle", x, w) + b[None]

    qh = proj(queries, params["wq"], params["bq"])
    kh = proj(keys, params["wk"], params["bk"])
    vh = proj(values, params["wv"], params["bv"])
    scores = jnp.einsum("bhle,bhse->bhls", qh, kh) / math.sqrt(E) + attn_bias
    scores = jnp.where(attn_mask[None, None], _MASK_VALUE, scores)
    attn = jax.nn.softmax(scores, axis=-1)
    out_h = jnp.einsum("bhls,bhsd->bhld", attn, vh)
    out = jnp.einsum("bhld,hdm->blm", out_h, params["wo"]) + params["bo"]
    return out, attn


# ----------------------------------- main -----------------------------------

if __name__ == "__main__":
    B, L, S = 2, 8, 8
    d_model, n_heads = 32, 4

    root = jax.random.PRNGKey(0)
    k_params, k_q, k_k, k_v, k_bias = jax.random.split(root, 5)

    layer = AttentionLayerPallas(d_model, n_heads, k_params)

    queries = jax.random.normal(k_q, (B, L, d_model), jnp.float32)
    keys = jax.random.normal(k_k, (B, S, d_model), jnp.float32)
    values = jax.random.normal(k_v, (B, S, d_model), jnp.float32)

    # causal attention mask (True above the diagonal = masked)
    attn_mask = jnp.triu(jnp.ones((L, S), dtype=bool), k=1)
    attn_bias = 0.1 * jax.random.normal(k_bias, (B, n_heads, L, S), jnp.float32)

    out, attn = layer(queries, keys, values, attn_mask, attn_bias)
    jax.block_until_ready((out, attn))

    assert out.shape == (B, L, d_model)
    assert attn.shape == (B, n_heads, L, S)
    assert bool(jnp.all(jnp.isfinite(out)))
    assert bool(jnp.all(jnp.isfinite(attn)))
    # attention rows must sum to ~1 (exact division in-kernel)
    assert bool(jnp.allclose(jnp.sum(attn, axis=-1), 1.0, atol=1e-4))

    # compare against a pure-JAX reference
    out_ref, attn_ref = reference_forward(layer.params, queries, keys, values,
                                          attn_mask, attn_bias)
    assert bool(jnp.allclose(out, out_ref, atol=2e-3, rtol=2e-3))
    assert bool(jnp.allclose(attn, attn_ref, atol=2e-3, rtol=2e-3))

    print("KERNEL_OK")
</pallas_src>

<mosaic_0001>
module attributes {stable_mosaic.version = 11 : i64} {
  func.func @_head_proj_kernel(%arg0: i32, %arg1: i32, %arg2: i32, %arg3: memref<1x8x32xf32, #tpu.memory_space<vmem>>, %arg4: memref<1x32x8xf32, #tpu.memory_space<vmem>>, %arg5: memref<1x1x8xf32, #tpu.memory_space<vmem>>, %arg6: memref<1x1x8x8xf32, #tpu.memory_space<vmem>>) attributes {dimension_semantics = [#tpu.dimension_semantics<parallel>, #tpu.dimension_semantics<parallel>, #tpu.dimension_semantics<arbitrary>], iteration_bounds = array<i64: 2, 1, 4>, scalar_prefetch = 0 : i64, scratch_operands = 0 : i64, tpu.core_type = #tpu.core_type<tc>, window_params = [{transform_indices = @transform_0, window_bounds = array<i64: 1, 8, 32>}, {transform_indices = @transform_1, window_bounds = array<i64: 1, 32, 8>}, {transform_indices = @transform_2, window_bounds = array<i64: 1, 1, 8>}, {transform_indices = @transform_3, window_bounds = array<i64: 1, 1, 8, 8>}]} {
    %c0 = arith.constant 0 : index
    %c0_0 = arith.constant 0 : index
    %c0_1 = arith.constant 0 : index
    %0 = vector.load %arg3[%c0, %c0_0, %c0_1] : memref<1x8x32xf32, #tpu.memory_space<vmem>>, vector<1x8x32xf32>
    %1 = vector.shape_cast %0 : vector<1x8x32xf32> to vector<8x32xf32>
    %c0_2 = arith.constant 0 : index
    %c0_3 = arith.constant 0 : index
    %c0_4 = arith.constant 0 : index
    %2 = vector.load %arg4[%c0_2, %c0_3, %c0_4] : memref<1x32x8xf32, #tpu.memory_space<vmem>>, vector<1x32x8xf32>
    %3 = vector.shape_cast %2 : vector<1x32x8xf32> to vector<32x8xf32>
    %cst = arith.constant dense<0.000000e+00> : vector<8x8xf32>
    %4 = tpu.matmul %1, %3, %cst {dimension_numbers = #tpu.dot_dimension_numbers<[1], [0], [0], [1], [0, 0, 1, 1], [], []>} : vector<8x32xf32>, vector<32x8xf32>, vector<8x8xf32> -> vector<8x8xf32>
    %c0_5 = arith.constant 0 : index
    %c0_6 = arith.constant 0 : index
    %c0_7 = arith.constant 0 : index
    %5 = vector.load %arg5[%c0_5, %c0_6, %c0_7] : memref<1x1x8xf32, #tpu.memory_space<vmem>>, vector<1x1x8xf32>
    %6 = vector.shape_cast %5 : vector<1x1x8xf32> to vector<1x8xf32>
    %7 = vector.broadcast %6 : vector<1x8xf32> to vector<8x8xf32>
    %8 = arith.addf %4, %7 : vector<8x8xf32>
    %c0_8 = arith.constant 0 : index
    %c0_9 = arith.constant 0 : index
    %c0_10 = arith.constant 0 : index
    %c0_11 = arith.constant 0 : index
    %9 = vector.load %arg6[%c0_8, %c0_9, %c0_10, %c0_11] : memref<1x1x8x8xf32, #tpu.memory_space<vmem>>, vector<1x1x8x8xf32>
    %10 = vector.shape_cast %9 : vector<1x1x8x8xf32> to vector<8x8xf32>
    %11 = vector.shape_cast %8 : vector<8x8xf32> to vector<1x1x8x8xf32>
    tpu.vector_store %arg6[%c0_8, %c0_9, %c0_10, %c0_11], %11 {strides = array<i32>} : memref<1x1x8x8xf32, #tpu.memory_space<vmem>>, vector<1x1x8x8xf32>,
    return
  }
  func.func @transform_0(%arg0: i32, %arg1: i32, %arg2: i32) -> (i32, i32, i32) {
    %c0_i32 = arith.constant 0 : i32
    %c0_i32_0 = arith.constant 0 : i32
    return %arg0, %arg1, %c0_i32 : i32, i32, i32
  }
  func.func @transform_1(%arg0: i32, %arg1: i32, %arg2: i32) -> (i32, i32, i32) {
    %c0_i32 = arith.constant 0 : i32
    %c0_i32_0 = arith.constant 0 : i32
    %c0_i32_1 = arith.constant 0 : i32
    return %arg2, %c0_i32, %c0_i32_0 : i32, i32, i32
  }
  func.func @transform_2(%arg0: i32, %arg1: i32, %arg2: i32) -> (i32, i32, i32) {
    %c0_i32 = arith.constant 0 : i32
    %c0_i32_0 = arith.constant 0 : i32
    %c0_i32_1 = arith.constant 0 : i32
    return %arg2, %c0_i32, %c0_i32_0 : i32, i32, i32
  }
  func.func @transform_3(%arg0: i32, %arg1: i32, %arg2: i32) -> (i32, i32, i32, i32) {
    %c0_i32 = arith.constant 0 : i32
    %c0_i32_0 = arith.constant 0 : i32
    return %arg0, %arg2, %arg1, %c0_i32 : i32, i32, i32, i32
  }
}

module attributes {stable_mosaic.version = 11 : i64} {
  func.func @_attn_kernel(%arg0: i32, %arg1: i32, %arg2: i32, %arg3: memref<1x1x8x8xf32, #tpu.memory_space<vmem>>, %arg4: memref<1x1x8x8xf32, #tpu.memory_space<vmem>>, %arg5: memref<1x1x8x8xf32, #tpu.memory_space<vmem>>, %arg6: memref<1x1x8x8xf32, #tpu.memory_space<vmem>>, %arg7: memref<8x8xf32, #tpu.memory_space<vmem>>, %arg8: memref<1x1x8x8xf32, #tpu.memory_space<vmem>>, %arg9: memref<1x1x8x8xf32, #tpu.memory_space<vmem>>) attributes {dimension_semantics = [#tpu.dimension_semantics<parallel>, #tpu.dimension_semantics<parallel>, #tpu.dimension_semantics<parallel>], iteration_bounds = array<i64: 2, 4, 1>, scalar_prefetch = 0 : i64, scratch_operands = 0 : i64, tpu.core_type = #tpu.core_type<tc>, window_params = [{transform_indices = @transform_0, window_bounds = array<i64: 1, 1, 8, 8>}, {transform_indices = @transform_1, window_bounds = array<i64: 1, 1, 8, 8>}, {transform_indices = @transform_2, window_bounds = array<i64: 1, 1, 8, 8>}, {transform_indices = @transform_3, window_bounds = array<i64: 1, 1, 8, 8>}, {transform_indices = @transform_4, window_bounds = array<i64: 8, 8>}, {transform_indices = @transform_5, window_bounds = array<i64: 1, 1, 8, 8>}, {transform_indices = @transform_6, window_bounds = array<i64: 1, 1, 8, 8>}]} {
    %c0 = arith.constant 0 : index
    %c0_0 = arith.constant 0 : index
    %c0_1 = arith.constant 0 : index
    %c0_2 = arith.constant 0 : index
    %0 = vector.load %arg3[%c0, %c0_0, %c0_1, %c0_2] : memref<1x1x8x8xf32, #tpu.memory_space<vmem>>, vector<1x1x8x8xf32>
    %1 = vector.shape_cast %0 : vector<1x1x8x8xf32> to vector<8x8xf32>
    %cst = arith.constant 0.353553385 : f32
    %2 = vector.broadcast %cst : f32 to vector<8x8xf32>
    %3 = arith.mulf %1, %2 : vector<8x8xf32>
    %c0_3 = arith.constant 0 : index
    %c0_4 = arith.constant 0 : index
    %c0_5 = arith.constant 0 : index
    %c0_6 = arith.constant 0 : index
    %4 = vector.load %arg4[%c0_3, %c0_4, %c0_5, %c0_6] : memref<1x1x8x8xf32, #tpu.memory_space<vmem>>, vector<1x1x8x8xf32>
    %5 = vector.shape_cast %4 : vector<1x1x8x8xf32> to vector<8x8xf32>
    %cst_7 = arith.constant dense<0.000000e+00> : vector<8x8xf32>
    %6 = tpu.matmul %3, %5, %cst_7 {dimension_numbers = #tpu.dot_dimension_numbers<[1], [1], [0], [0], [0, 0, 1, 0], [], []>} : vector<8x8xf32>, vector<8x8xf32>, vector<8x8xf32> -> vector<8x8xf32>
    %c0_8 = arith.constant 0 : index
    %c0_9 = arith.constant 0 : index
    %c0_10 = arith.constant 0 : index
    %c0_11 = arith.constant 0 : index
    %7 = vector.load %arg6[%c0_8, %c0_9, %c0_10, %c0_11] : memref<1x1x8x8xf32, #tpu.memory_space<vmem>>, vector<1x1x8x8xf32>
    %8 = vector.shape_cast %7 : vector<1x1x8x8xf32> to vector<8x8xf32>
    %9 = arith.addf %6, %8 : vector<8x8xf32>
    %c0_12 = arith.constant 0 : index
    %c0_13 = arith.constant 0 : index
    %10 = vector.load %arg7[%c0_12, %c0_13] : memref<8x8xf32, #tpu.memory_space<vmem>>, vector<8x8xf32>
    %cst_14 = arith.constant 0.000000e+00 : f32
    %11 = vector.broadcast %cst_14 : f32 to vector<8x8xf32>
    %12 = arith.cmpf one, %10, %11 : vector<8x8xf32>
    %cst_15 = arith.constant -1.000000e+30 : f32
    %13 = vector.broadcast %cst_15 : f32 to vector<8x8xf32>
    %14 = arith.select %12, %13, %9 : vector<8x8xi1>, vector<8x8xf32>
    %cst_16 = arith.constant dense<0xFF800000> : vector<8xf32>
    %15 = vector.multi_reduction <maximumf>, %14, %cst_16 [1] : vector<8x8xf32> to vector<8xf32>
    %16 = vector.shape_cast %15 : vector<8xf32> to vector<8x1xf32>
    %17 = vector.broadcast %16 : vector<8x1xf32> to vector<8x8xf32>
    %18 = arith.subf %14, %17 : vector<8x8xf32>
    %19 = math.exp %18 : vector<8x8xf32>
    %cst_17 = arith.constant dense<0.000000e+00> : vector<8xf32>
    %20 = vector.multi_reduction <add>, %19, %cst_17 [1] : vector<8x8xf32> to vector<8xf32>
    %21 = vector.shape_cast %20 : vector<8xf32> to vector<8x1xf32>
    %22 = vector.broadcast %21 : vector<8x1xf32> to vector<8x8xf32>
    %23 = arith.divf %19, %22 : vector<8x8xf32>
    %c0_18 = arith.constant 0 : index
    %c0_19 = arith.constant 0 : index
    %c0_20 = arith.constant 0 : index
    %c0_21 = arith.constant 0 : index
    %24 = vector.load %arg5[%c0_18, %c0_19, %c0_20, %c0_21] : memref<1x1x8x8xf32, #tpu.memory_space<vmem>>, vector<1x1x8x8xf32>
    %25 = vector.shape_cast %24 : vector<1x1x8x8xf32> to vector<8x8xf32>
    %cst_22 = arith.constant dense<0.000000e+00> : vector<8x8xf32>
    %26 = tpu.matmul %23, %25, %cst_22 {dimension_numbers = #tpu.dot_dimension_numbers<[1], [0], [0], [1], [0, 0, 1, 1], [], []>} : vector<8x8xf32>, vector<8x8xf32>, vector<8x8xf32> -> vector<8x8xf32>
    %c0_23 = arith.constant 0 : index
    %c0_24 = arith.constant 0 : index
    %c0_25 = arith.constant 0 : index
    %c0_26 = arith.constant 0 : index
    %27 = vector.load %arg8[%c0_23, %c0_24, %c0_25, %c0_26] : memref<1x1x8x8xf32, #tpu.memory_space<vmem>>, vector<1x1x8x8xf32>
    %28 = vector.shape_cast %27 : vector<1x1x8x8xf32> to vector<8x8xf32>
    %29 = vector.shape_cast %26 : vector<8x8xf32> to vector<1x1x8x8xf32>
    tpu.vector_store %arg8[%c0_23, %c0_24, %c0_25, %c0_26], %29 {strides = array<i32>} : memref<1x1x8x8xf32, #tpu.memory_space<vmem>>, vector<1x1x8x8xf32>,
    %c0_27 = arith.constant 0 : index
    %c0_28 = arith.constant 0 : index
    %c0_29 = arith.constant 0 : index
    %c0_30 = arith.constant 0 : index
    %30 = vector.load %arg9[%c0_27, %c0_28, %c0_29, %c0_30] : memref<1x1x8x8xf32, #tpu.memory_space<vmem>>, vector<1x1x8x8xf32>
    %31 = vector.shape_cast %30 : vector<1x1x8x8xf32> to vector<8x8xf32>
    %32 = vector.shape_cast %23 : vector<8x8xf32> to vector<1x1x8x8xf32>
    tpu.vector_store %arg9[%c0_27, %c0_28, %c0_29, %c0_30], %32 {strides = array<i32>} : memref<1x1x8x8xf32, #tpu.memory_space<vmem>>, vector<1x1x8x8xf32>,
    return
  }
  func.func @transform_0(%arg0: i32, %arg1: i32, %arg2: i32) -> (i32, i32, i32, i32) {
    %c0_i32 = arith.constant 0 : i32
    %c0_i32_0 = arith.constant 0 : i32
    return %arg0, %arg1, %arg2, %c0_i32 : i32, i32, i32, i32
  }
  func.func @transform_1(%arg0: i32, %arg1: i32, %arg2: i32) -> (i32, i32, i32, i32) {
    %c0_i32 = arith.constant 0 : i32
    %c0_i32_0 = arith.constant 0 : i32
    %c0_i32_1 = arith.constant 0 : i32
    return %arg0, %arg1, %c0_i32, %c0_i32_0 : i32, i32, i32, i32
  }
  func.func @transform_2(%arg0: i32, %arg1: i32, %arg2: i32) -> (i32, i32, i32, i32) {
    %c0_i32 = arith.constant 0 : i32
    %c0_i32_0 = arith.constant 0 : i32
    %c0_i32_1 = arith.constant 0 : i32
    return %arg0, %arg1, %c0_i32, %c0_i32_0 : i32, i32, i32, i32
  }
  func.func @transform_3(%arg0: i32, %arg1: i32, %arg2: i32) -> (i32, i32, i32, i32) {
    %c0_i32 = arith.constant 0 : i32
    %c0_i32_0 = arith.constant 0 : i32
    return %arg0, %arg1, %arg2, %c0_i32 : i32, i32, i32, i32
  }
  func.func @transform_4(%arg0: i32, %arg1: i32, %arg2: i32) -> (i32, i32) {
    %c0_i32 = arith.constant 0 : i32
    %c0_i32_0 = arith.constant 0 : i32
    return %arg2, %c0_i32 : i32, i32
  }
  func.func @transform_5(%arg0: i32, %arg1: i32, %arg2: i32) -> (i32, i32, i32, i32) {
    %c0_i32 = arith.constant 0 : i32
    %c0_i32_0 = arith.constant 0 : i32
    return %arg0, %arg1, %arg2, %c0_i32 : i32, i32, i32, i32
  }
  func.func @transform_6(%arg0: i32, %arg1: i32, %arg2: i32) -> (i32, i32, i32, i32) {
    %c0_i32 = arith.constant 0 : i32
    %c0_i32_0 = arith.constant 0 : i32
    return %arg0, %arg1, %arg2, %c0_i32 : i32, i32, i32, i32
  }
}

module attributes {stable_mosaic.version = 11 : i64} {
  func.func @_out_proj_kernel(%arg0: i32, %arg1: i32, %arg2: i32, %arg3: memref<1x1x8x8xf32, #tpu.memory_space<vmem>>, %arg4: memref<1x8x32xf32, #tpu.memory_space<vmem>>, %arg5: memref<1x32xf32, #tpu.memory_space<vmem>>, %arg6: memref<1x8x32xf32, #tpu.memory_space<vmem>>, %arg7: memref<8x32xf32, #tpu.memory_space<vmem>>) attributes {dimension_semantics = [#tpu.dimension_semantics<parallel>, #tpu.dimension_semantics<parallel>, #tpu.dimension_semantics<arbitrary>], iteration_bounds = array<i64: 2, 1, 4>, scalar_prefetch = 0 : i64, scratch_operands = 1 : i64, tpu.core_type = #tpu.core_type<tc>, window_params = [{transform_indices = @transform_0, window_bounds = array<i64: 1, 1, 8, 8>}, {transform_indices = @transform_1, window_bounds = array<i64: 1, 8, 32>}, {pipeline_mode = #tpu.pipeline_mode<synchronous>, transform_indices = @transform_2, window_bounds = array<i64: 1, 32>}, {transform_indices = @transform_3, window_bounds = array<i64: 1, 8, 32>}]} {
    %c0_i32 = arith.constant 0 : i32
    %0 = arith.cmpi eq, %arg2, %c0_i32 : i32
    %1 = arith.extui %0 : i1 to i32
    %c0_i32_0 = arith.constant 0 : i32
    %2 = arith.cmpi ne, %1, %c0_i32_0 : i32
    scf.if %2 {
      %cst_12 = arith.constant 0.000000e+00 : f32
      %14 = vector.broadcast %cst_12 : f32 to vector<8x32xf32>
      %c0_13 = arith.constant 0 : index
      %c0_14 = arith.constant 0 : index
      %15 = vector.load %arg7[%c0_13, %c0_14] : memref<8x32xf32, #tpu.memory_space<vmem>>, vector<8x32xf32>
      tpu.vector_store %arg7[%c0_13, %c0_14], %14 {strides = array<i32>} : memref<8x32xf32, #tpu.memory_space<vmem>>, vector<8x32xf32>,
    } else {
    }
    %c0 = arith.constant 0 : index
    %c0_1 = arith.constant 0 : index
    %3 = vector.load %arg7[%c0, %c0_1] : memref<8x32xf32, #tpu.memory_space<vmem>>, vector<8x32xf32>
    %c0_2 = arith.constant 0 : index
    %c0_3 = arith.constant 0 : index
    %c0_4 = arith.constant 0 : index
    %c0_5 = arith.constant 0 : index
    %4 = vector.load %arg3[%c0_2, %c0_3, %c0_4, %c0_5] : memref<1x1x8x8xf32, #tpu.memory_space<vmem>>, vector<1x1x8x8xf32>
    %5 = vector.shape_cast %4 : vector<1x1x8x8xf32> to vector<8x8xf32>
    %c0_6 = arith.constant 0 : index
    %c0_7 = arith.constant 0 : index
    %c0_8 = arith.constant 0 : index
    %6 = vector.load %arg4[%c0_6, %c0_7, %c0_8] : memref<1x8x32xf32, #tpu.memory_space<vmem>>, vector<1x8x32xf32>
    %7 = vector.shape_cast %6 : vector<1x8x32xf32> to vector<8x32xf32>
    %cst = arith.constant dense<0.000000e+00> : vector<8x32xf32>
    %8 = tpu.matmul %5, %7, %cst {dimension_numbers = #tpu.dot_dimension_numbers<[1], [0], [0], [1], [0, 0, 1, 1], [], []>} : vector<8x8xf32>, vector<8x32xf32>, vector<8x32xf32> -> vector<8x32xf32>
    %9 = arith.addf %3, %8 : vector<8x32xf32>
    %c0_9 = arith.constant 0 : index
    %c0_10 = arith.constant 0 : index
    %10 = vector.load %arg7[%c0_9, %c0_10] : memref<8x32xf32, #tpu.memory_space<vmem>>, vector<8x32xf32>
    tpu.vector_store %arg7[%c0_9, %c0_10], %9 {strides = array<i32>} : memref<8x32xf32, #tpu.memory_space<vmem>>, vector<8x32xf32>,
    %c3_i32 = arith.constant 3 : i32
    %11 = arith.cmpi eq, %arg2, %c3_i32 : i32
    %12 = arith.extui %11 : i1 to i32
    %c0_i32_11 = arith.constant 0 : i32
    %13 = arith.cmpi ne, %12, %c0_i32_11 : i32
    scf.if %13 {
      %c0_12 = arith.constant 0 : index
      %c0_13 = arith.constant 0 : index
      %14 = vector.load %arg7[%c0_12, %c0_13] : memref<8x32xf32, #tpu.memory_space<vmem>>, vector<8x32xf32>
      %c0_14 = arith.constant 0 : index
      %c0_15 = arith.constant 0 : index
      %15 = vector.load %arg5[%c0_14, %c0_15] : memref<1x32xf32, #tpu.memory_space<vmem>>, vector<1x32xf32>
      %16 = vector.broadcast %15 : vector<1x32xf32> to vector<8x32xf32>
      %17 = arith.addf %14, %16 : vector<8x32xf32>
      %c0_16 = arith.constant 0 : index
      %c0_17 = arith.constant 0 : index
      %c0_18 = arith.constant 0 : index
      %18 = vector.load %arg6[%c0_16, %c0_17, %c0_18] : memref<1x8x32xf32, #tpu.memory_space<vmem>>, vector<1x8x32xf32>
      %19 = vector.shape_cast %18 : vector<1x8x32xf32> to vector<8x32xf32>
      %20 = vector.shape_cast %17 : vector<8x32xf32> to vector<1x8x32xf32>
      tpu.vector_store %arg6[%c0_16, %c0_17, %c0_18], %20 {strides = array<i32>} : memref<1x8x32xf32, #tpu.memory_space<vmem>>, vector<1x8x32xf32>,
    } else {
    }
    return
  }
  func.func @transform_0(%arg0: i32, %arg1: i32, %arg2: i32) -> (i32, i32, i32, i32) {
    %c0_i32 = arith.constant 0 : i32
    %c0_i32_0 = arith.constant 0 : i32
    return %arg0, %arg2, %arg1, %c0_i32 : i32, i32, i32, i32
  }
  func.func @transform_1(%arg0: i32, %arg1: i32, %arg2: i32) -> (i32, i32, i32) {
    %c0_i32 = arith.constant 0 : i32
    %c0_i32_0 = arith.constant 0 : i32
    %c0_i32_1 = arith.constant 0 : i32
    return %arg2, %c0_i32, %c0_i32_0 : i32, i32, i32
  }
  func.func @transform_2(%arg0: i32, %arg1: i32, %arg2: i32) -> (i32, i32) {
    %c0_i32 = arith.constant 0 : i32
    %c0_i32_0 = arith.constant 0 : i32
    %c0_i32_1 = arith.constant 0 : i32
    return %c0_i32, %c0_i32_0 : i32, i32
  }
  func.func @transform_3(%arg0: i32, %arg1: i32, %arg2: i32) -> (i32, i32, i32) {
    %c0_i32 = arith.constant 0 : i32
    %c0_i32_0 = arith.constant 0 : i32
    return %arg0, %arg1, %c0_i32 : i32, i32, i32
  }
}

</mosaic_0001>

<bundles_post_ra>
// kernel: attention_layer_forward.6
= control target key start
LH: loop header
LB: loop body
LE: loop exit
PB: predicated region body
PF: predicated region fallthrough
CT: control target
= control target key end

     0   :  { %s1325_s0 = inlined_call_operand.hbm [shape: f32[2,8,32], index: 0, kind: input, shape index: {}]   ;;  %s1326_s1 = inlined_call_operand.hbm [shape: f32[4,32,8], index: 1, kind: input, shape index: {}]   ;;  %s1327_s2 = inlined_call_operand.hbm [shape: f32[4,1,8], index: 2, kind: input, shape index: {}]   ;;  %s1328_s3 = inlined_call_operand.hbm [shape: f32[2,4,8,8], index: 3, kind: output, shape index: {}]  }
   0x1   :  { %1342 = sst [smem:[#allocation21_spill]] %s1325_s0 }
   0x2   :  { %1343 = sst [smem:[#allocation22_spill]] %s1326_s1 }
   0x3   :  { %1344 = sst [smem:[#allocation23_spill]] %s1328_s3 }
   0x4   :  { %8 = vsyncpa [#allocation3], 0 }
   0x5   :  { %10 = vsyncpa [#allocation3 + $0x1], 0 }
   0x6   :  { %11 = vsyncpa [#allocation6], 0 }
   0x7   :  { %13 = vsyncpa [#allocation6 + $0x1], 0 }
   0x8   :  { %14 = vsyncpa [#allocation4], 0 }
   0x9   :  { %16 = vsyncpa [#allocation4 + $0x1], 0  ;;  %s972_s12 = smov 0   ;;  %s974_s13 = smov 0  }
   0xa   :  { %s976_s14 = smov 0   ;;  %s978_s15 = smov 0  }
   0xb   :  { %s980_s16 = smov 0   ;;  %s982_s17 = smov 0  }
   0xc   :  { %s984_s18 = smov 0   ;;  %s986_s19 = smov 0  }
   0xd   :  { %s988_s20 = smov 0   ;;  %s990_s21 = smov 0  }
   0xe   :  { %s992_s22 = smov 0   ;;  %s994_s23 = smov 0  }
   0xf   :  { %s996_s24 = smov 0   ;;  %s998_s25 = smov 0  }
  0x10 LB: > { %1345 = sst [smem:[#allocation12_spill]] %s921_s20  ;;  %p58_p0 = scmp.eq.s32.totalorder %s941_s25, 0  ;;  %s941_s25 = sphi %s998_s25, %s22_s25   ;;  %s937_s24 = sphi %s996_s24, %s1385_s24   ;;  %s933_s23 = sphi %s994_s23, %s1396_s23   ;;  %s929_s22 = sphi %s992_s22, %s1395_s22   ;;  %s925_s21 = sphi %s990_s21, %s1394_s21   ;;  %s921_s20 = sphi %s988_s20, %s1382_s20   ;;  %s917_s19 = sphi %s986_s19, %s1393_s19   ;;  %s913_s18 = sphi %s984_s18, %s1392_s18   ;;  %s909_s17 = sphi %s982_s17, %s1391_s17   ;;  %s905_s16 = sphi %s980_s16, %s1390_s16   ;;  %s901_s15 = sphi %s978_s15, %s1389_s15   ;;  %s897_s14 = sphi %s976_s14, %s1388_s14   ;;  %s893_s13 = sphi %s974_s13, %s1387_s13   ;;  %s889_s12 = sphi %s972_s12, %s1386_s12  }
  0x11   : > { %1346 = sst [smem:[#allocation13_spill]] %s925_s21  ;;  %p83_p1 = scmp.ne.s32.totalorder %s909_s17, %s905_s16 }
  0x12   : > { %1347 = sst [smem:[#allocation14_spill]] %s929_s22  ;;  %p1329_p3 = scmp.lt.s32.totalorder %s941_s25, 8 }
  0x13   : > { %1348 = sst [smem:[#allocation15_spill]] %s937_s24  ;;  %p85_p4 = por %p83_p1, %p58_p0 }
  0x14   : > { %s188_s27 = sand.u32 1, %s941_s25   ;;  %s1330_s28 = sand.u32 1, %s909_s17  }
  0x15   : > { %s522_s29 = sshll.u32 %s1330_s28, 5  ;;  %s537_s30 = sshll.u32 %s933_s23, 9 }
  0x16   : > { %s1349_s1 = sld [smem:[#allocation22_spill]]  ;;  %s192_s7 = scalar_lea.vmem [#allocation5], %s522_s29 }
  0x17   : > { %s199_s8 = sshll.u32 %s192_s7, 4  ;;  %p1063_p5 = pnand %p1329_p3, %p85_p4  ;;  %s1067_s8 = int_to_ptr.vmem [resolvable:$true] %s199_s8 }
  0x18   : > { %s1069_s10 = scalar_lea.sflag [#allocation6], %s188_s27 }
  0x19   : > { %p1333_p7 = pneg %p1063_p5 }
  0x1c   : > { %s1059_s6 = scalar_lea.hbm %s1349_s1, %s537_s30  ;;  %s706_s4 = scalar_lea.hbm %s1349_s1, 2048 }
  0x1d   : > { %s701_s11 = scalar_lea.hbm %s1059_s6, 512  ;;  %p707_p10 = scmp.lt.u32.totalorder %s1059_s6, %s1349_s1 }
  0x1e   : > { %p702_p6 = scmp.ne.s32.totalorder %s1059_s6, %s701_s11  ;;  %p708_p11 = scmp.lt.u32.totalorder %s706_s4, %s701_s11 }
  0x1f   : > { %p710_p13 = scmp.lt.u32.totalorder %s701_s11, %s1059_s6 }
  0x20   : > { %p704_p8 = pnand %p1333_p7, %p702_p6  ;;  %p709_p12 = por %p708_p11, %p707_p10 }
  0x22   : > { %p705_p9 = pneg %p704_p8  ;;  %p711_p1 = por %p710_p13, %p709_p12 }
  0x24   : > { %p712_p4 = pnand %p711_p1, %p705_p9 }
  0x26   : > { %715 = shalt.err (!%p712_p4)
}
  0x27   : > { %s716_s27 = scalar_lea.vmem %s1067_s8, 512  ;;  %s943_s29 = smov [#allocation5]  }
  0x28   : > { %p717_p6 = scmp.ne.s32.totalorder %s1067_s8, %s716_s27  ;;  %s721_s30 = sshll.u32 %s943_s29, 4  ;;  %s722_s30 = int_to_ptr.vmem [resolvable:$false] %s721_s30 }
  0x29   : > { %s723_s5 = scalar_lea.vmem %s722_s30, 1024  ;;  %p724_p2 = scmp.lt.s32.totalorder %s1067_s8, %s722_s30 }
  0x2a   : > { %p719_p8 = pnand %p717_p6, %p1333_p7  ;;  %p725_p10 = scmp.lt.s32.totalorder %s723_s5, %s716_s27 }
  0x2c   : > { %p720_p3 = pneg %p719_p8  ;;  %p726_p11 = por %p725_p10, %p724_p2 }
  0x2e   : > { %p727_p12 = pnand %p726_p11, %p720_p3 }
  0x30   : > { %730 = shalt.err (!%p727_p12)
}
  0x31   : > { %s944_s11 = smov 128   ;;  %s945_s4 = smov 8  }
  0x32   : > { %574 = dma.hbm_to_vmem [thread:$0]  (!%p1063_p5), %s1059_s6, 512, %s1067_s8, %s1069_s10, %s944_s11, %s944_s11, %s945_s4  }
  0x33   : > { %p526_p2 = scmp.ge.s32.totalorder %s941_s25, 1  ;;  %p224_p3 = scmp.lt.s32.totalorder %s941_s25, 9 }
  0x34   : > { %s1104_s27 = sadd.s32 4294967295, %s941_s25   ;;  %s517_s29 = sadd.s32 4294967294, %s941_s25  }
  0x35   : > { %p1099_p9 = pnand %p526_p2, %p224_p3  ;;  %s34_s30 = sadd.s32 1, %s933_s23 }
  0x36   : > { %p35_p13 = scmp.ge.s32.totalorder %s34_s30, 4  ;;  %s41_s5 = sadd.s32 1, %s937_s24 }
  0x37   : > { %s1351_s7 = scalar_select %p1099_p9, 1, 0 }
  0x38   : > { %s50_s28 = sadd.s32 1, %s921_s20  ;;  %p57_p1 = scmp.ne.s32.totalorder %s921_s20, %s917_s19 }
  0x39   : > { %s1398_s30 = smov (%p35_p13, %s34_s30), 0  ;;  %s1400_s5 = smov (!%p35_p13, %s41_s5), %s937_s24 }
  0x3a   : > { %1352 = sst [smem:[#allocation16_spill]] %s1398_s30  ;;  %p1117_p4 = por %p58_p0, %p57_p1 }
  0x3b   : > { %p63_p6 = scmp.ne.s32.totalorder %s917_s19, %s913_s18  ;;  %p43_p8 = scmp.ge.s32.totalorder %s1400_s5, 2 }
  0x3c   : > { %p64_p10 = scmp.eq.s32.totalorder %s1104_s27, 0  ;;  %s73_s8 = ssub.s32 %s933_s23, %s1398_s30 }
  0x3d   : > { %s132_s11 = sadd.s32 1, %s897_s14  ;;  %s1402_s5 = smov (%p43_p8, %s1400_s5), 0 }
  0x3e   : > { %1354 = sst [smem:[#allocation17_spill]] %s1402_s5  ;;  %p1129_p11 = por %p64_p10, %p63_p6 }
  0x3f   : > { %p74_p0 = scmp.eq.s32.totalorder %s73_s8, 0  ;;  %s45_s26 = ssub.s32 %s937_s24, %s1402_s5 }
  0x40   : > { %s1355_s4 = scalar_select %p1129_p11, 1, 0 }
  0x41   : > { %p1356_p12 = scmp.ne.s32.totalorder %s905_s16, %s901_s15  ;;  %p48_p3 = scmp.eq.s32.totalorder %s45_s26, 0 }
  0x42   : > { %s127_s1 = sor.u32 %s73_s8, %s45_s26  ;;  %s1359_s30 = sadd.s32 1, %s909_s17 }
  0x43   : > { %p1138_p2 = por %p1356_p12, %p64_p10  ;;  %p130_p13 = scmp.eq.s32.totalorder %s127_s1, 0 }
  0x44   : > { %s1145_s3 = scalar_select %p74_p0, %s909_s17, %s1359_s30  }
  0x45   : > { %s1357_s18 = scalar_select %p1138_p2, 1, 0 }
  0x46   : > { %1360 = sst [smem:[#allocation19_spill]] %s1145_s3  ;;  %p142_p1 = scmp.ne.s32.totalorder %s897_s14, %s893_s13 }
  0x47   : > { %1358 = sst [smem:[#allocation18_spill]] %s1357_s18  ;;  %p143_p6 = scmp.eq.s32.totalorder %s1104_s27, 7 }
  0x48   : > { %s1148_s21 = scalar_select %p48_p3, %s921_s20, %s50_s28  }
  0x49   : > { %p148_p8 = scmp.ne.s32.totalorder %s893_s13, %s889_s12  ;;  %p1158_p7 = por %p143_p6, %p142_p1 }
  0x4a   : > { %1361 = sst [smem:[#allocation20_spill]] %s1148_s21  ;;  %p149_p10 = scmp.eq.s32.totalorder %s517_s29, 7 }
  0x4b   : > { %s1156_s22 = scalar_select %p130_p13, %s897_s14, %s132_s11  }
  0x4c   : > { %s1362_s15 = scalar_select %p1158_p7, 1, 0 }
  0x4d   : > { %s169_s5 = sand.u32 1, %s921_s20   ;;  %s521_s18 = sshll.u32 %s937_s24, 7 }
  0x4e   : > { %p1164_p12 = por %p149_p10, %p148_p8  ;;  %s520_s30 = sshll.u32 %s169_s5, 3 }
  0x4f   : > { %s1364_s0 = sld [smem:[#allocation21_spill]]  ;;  %p1365_p0 = scmp.lt.s32.totalorder %s941_s25, 8 }
  0x50   : > { %s1363_s26 = scalar_select %p1164_p12, 1, 0 }
  0x51   : > { %p1177_p3 = pnand %p1365_p0, %p1117_p4  ;;  %s173_s11 = scalar_lea.vmem [#allocation2], %s520_s30 }
  0x52   : > { %s181_s24 = sshll.u32 %s173_s11, 4  ;;  %s170_s21 = scalar_lea.sflag [#allocation3], %s169_s5  ;;  %s1181_s24 = int_to_ptr.vmem [resolvable:$true] %s181_s24 }
  0x53   : > { %p733_p1 = pneg %p1177_p3 }
  0x55   : > { %s1171_s1 = scalar_lea.hbm %s1364_s0, %s521_s18  ;;  %s736_s8 = scalar_lea.hbm %s1364_s0, 256 }
  0x56   : > { %s731_s28 = scalar_lea.hbm %s1171_s1, 128  ;;  %p737_p4 = scmp.lt.u32.totalorder %s1171_s1, %s1364_s0 }
  0x57   : > { %p732_p13 = scmp.ne.s32.totalorder %s1171_s1, %s731_s28  ;;  %p738_p10 = scmp.lt.u32.totalorder %s736_s8, %s731_s28 }
  0x58   : > { %p740_p12 = scmp.lt.u32.totalorder %s731_s28, %s1171_s1 }
  0x59   : > { %p734_p6 = pnand %p733_p1, %p732_p13  ;;  %p739_p0 = por %p738_p10, %p737_p4 }
  0x5b   : > { %p735_p8 = pneg %p734_p6  ;;  %p741_p7 = por %p740_p12, %p739_p0 }
  0x5d   : > { %p742_p2 = pnand %p741_p7, %p735_p8 }
  0x5f   : > { %745 = shalt.err (!%p742_p2)
}
  0x60   : > { %s746_s5 = scalar_lea.vmem %s1181_s24, 128  ;;  %s946_s30 = smov [#allocation2]  }
  0x61   : > { %p747_p13 = scmp.ne.s32.totalorder %s1181_s24, %s746_s5  ;;  %s751_s11 = sshll.u32 %s946_s30, 4  ;;  %s752_s11 = int_to_ptr.vmem [resolvable:$false] %s751_s11 }
  0x62   : > { %s753_s3 = scalar_lea.vmem %s752_s11, 256  ;;  %p754_p9 = scmp.lt.s32.totalorder %s1181_s24, %s752_s11 }
  0x63   : > { %p749_p6 = pnand %p747_p13, %p733_p1  ;;  %p755_p4 = scmp.lt.s32.totalorder %s753_s3, %s746_s5 }
  0x65   : > { %p750_p11 = pneg %p749_p6  ;;  %p756_p10 = por %p755_p4, %p754_p9 }
  0x67   : > { %p757_p12 = pnand %p756_p10, %p750_p11 }
  0x69   : > { %760 = shalt.err (!%p757_p12)
}
  0x6a   : > { %571 = dma.hbm_to_vmem [thread:$0]  (!%p1177_p3), %s1171_s1, 128, %s1181_s24, %s170_s21  }
  0x6b   : > { %s525_s20 = sshll.u32 %s933_s23, 4  ;;  %s1367_s28 = sand.u32 1, %s909_s17  }
  0x6c   : > { %s212_s6 = scalar_lea.vmem [#allocation7], %s1367_s28  ;;  %s217_s11 = scalar_lea.hbm %s1327_s2, %s525_s20 }
  0x6d   : > { %s219_s18 = sshll.u32 %s212_s6, 4  ;;  %s761_s5 = scalar_lea.hbm %s217_s11, 16  ;;  %s220_s18 = int_to_ptr.vmem [resolvable:$true] %s219_s18 }
  0x6e   : > { %p762_p7 = scmp.ne.s32.totalorder %s217_s11, %s761_s5  ;;  %p1368_p9 = pneg %p1063_p5 }
  0x6f   : > { %s766_s0 = scalar_lea.hbm %s1327_s2, 64  ;;  %p767_p3 = scmp.lt.u32.totalorder %s217_s11, %s1327_s2 }
  0x70   : > { %p764_p11 = pnand %p762_p7, %p1368_p9  ;;  %p768_p1 = scmp.lt.u32.totalorder %s766_s0, %s761_s5 }
  0x71   : > { %p770_p0 = scmp.lt.u32.totalorder %s761_s5, %s217_s11 }
  0x72   : > { %p765_p2 = pneg %p764_p11  ;;  %p769_p8 = por %p768_p1, %p767_p3 }
  0x74   : > { %p771_p13 = por %p770_p0, %p769_p8 }
  0x76   : > { %p772_p6 = pnand %p771_p13, %p765_p2 }
  0x78   : > { %775 = shalt.err (!%p772_p6)
}
  0x79   : > { %s776_s1 = scalar_lea.vmem %s220_s18, 16  ;;  %p1369_p10 = pmov %p1368_p9 }
  0x7a   : > { %p777_p4 = scmp.ne.s32.totalorder %s220_s18, %s776_s1  ;;  %s947_s20 = smov [#allocation7]  }
  0x7b   : > { %s781_s28 = sshll.u32 %s947_s20, 4  ;;  %s782_s28 = int_to_ptr.vmem [resolvable:$false] %s781_s28 }
  0x7c   : > { %p779_p12 = pnand %p777_p4, %p1369_p10  ;;  %s783_s6 = scalar_lea.vmem %s782_s28, 32 }
  0x7d   : > { %p784_p9 = scmp.lt.s32.totalorder %s220_s18, %s782_s28  ;;  %p785_p11 = scmp.lt.s32.totalorder %s783_s6, %s776_s1 }
  0x7e   : > { %p780_p7 = pneg %p779_p12 }
  0x7f   : > { %p786_p1 = por %p785_p11, %p784_p9 }
  0x81   : > { %p787_p3 = pnand %p786_p1, %p780_p7 }
  0x83   : > { %790 = shalt.err (!%p787_p3)
}
  0x84   : > { %577 = dma.hbm_to_vmem [thread:$0]  (!%p1063_p5), %s217_s11, 16, %s220_s18, %s1069_s10  }
  0x85   : > { %p1370_p2 = scmp.ne.s32.totalorder %s1351_s7, 0 }
  0x86   : > { %s230_s0 = sand.u32 (!%p1370_p2), 1, %s917_s19   ;;  %p1371_p8 = scmp.ne.s32.totalorder (!%p1370_p2), %s1355_s4, 0 }
  0x87   : > { %228 = sbr.rel (%p1370_p2) target bundleno = 391 (0x187), region = 32  ;;  %s527_s8 = sshll.u32 (!%p1370_p2), %s230_s0, 3 }
  0x88   : > { %s231_s30 = scalar_lea.sflag (!%p1370_p2), [#allocation3], %s230_s0  ;;  %s234_s5 = scalar_lea.vmem (!%p1370_p2), [#allocation2], %s527_s8 }
  0x8e   : > { %876 = dma.done.wait (%p1371_p8), %s231_s30, 128  }
  0x8f   : > { %878 = vsyncadd (%p1371_p8), %s231_s30, 4294967168  ;;  %s1372_s29 = sld [smem:[#allocation18_spill]]  ;;  %s239_s9 = sand.u32 1, %s1104_s27  }
  0x90   : > { %s241_s3 = sand.u32 1, %s905_s16   ;;  %s240_s18 = scalar_lea.sflag [#allocation6], %s239_s9 }
  0x91   : > { %s528_s10 = sshll.u32 %s241_s3, 5 }
  0x92   : > { %s243_s7 = scalar_lea.vmem [#allocation5], %s528_s10 }
  0x95   : > { %p1373_p5 = scmp.ne.s32.totalorder %s1372_s29, 0 }
  0x97   : > { %880 = dma.done.wait (%p1373_p5), %s240_s18, 528  }
  0x98   : > { %882 = vsyncadd (%p1373_p5), %s240_s18, 4294966768  ;;  %v948_v0 = vmov 0.0|0.0   ;;  %vm949_vm0 = vmmov 0   ;;  %v950_v1 = vmov 0.0   ;;  %s1374_s4 = sld [smem:[#allocation14_spill]]  ;;  %s1375_s11 = sld [smem:[#allocation13_spill]] }
  0x99   : > { %554 = vmatprep.subr.bf16.mxu0 %v948_v0  ;;  %551 = vmatprep.mubr.msk.f32.mxu0 %vm949_vm0, %v950_v1  ;;  %v284_v2 = vld [vmem:[%s243_s7] sm:$0xff]  ;;  %v285_v3 = vld [vmem:[%s243_s7 + $0x8] sm:$0xff]  ;;  %v286_v4 = vld [vmem:[%s243_s7 + $0x10] sm:$0xff]  ;;  %vm295_vm1 = vcmask 261120   ;;  %s280_s27 = sand.u32 1, %s893_s13   ;;  %s251_s20 = scalar_lea.vmem [#allocation7], %s241_s3 }
  0x9a   : > { %v555_v5 = vpack.c.bf16 %v285_v3, %v284_v2  ;;  %v287_v6 = vld [vmem:[%s243_s7 + $0x18] sm:$0xff]  ;;  %s529_s21 = sshll.u32 %s280_s27, 3  ;;  %v530_v9 = vld [vmem:[%s251_s20] ss:$0 sm:$0xff]  ;;  %vm369_vm2 = vcmask 64512   ;;  %s1376_s29 = sld [smem:[#allocation23_spill]] }
  0x9b   : > { %v558_v7 = vpack.c.bf16 %v287_v6, %v286_v4  ;;  %v283_v8 = vld [vmem:[%s234_s5] sm:$0xff]  ;;  %s282_s6 = scalar_lea.vmem [#allocation8], %s529_s21  ;;  %s372_s9 = scalar_lea.sflag [#allocation4], %s280_s27 }
  0x9c   : > { %556 = vmatpush3.bf16.msra.mxu0 %v555_v5  ;;  %s388_s0 = sshll.u32 %s282_s6, 4  ;;  %p1377_p13 = scmp.ne.s32.totalorder %s1362_s15, 0  ;;  %s1250_s0 = int_to_ptr.vmem [resolvable:$true] %s388_s0 }
  0x9d   : > { %557 = vmatprep.subr.bf16.mxu0 %v948_v0  ;;  %s791_s3 = scalar_lea.vmem %s1250_s0, 128  ;;  %s951_s10 = smov [#allocation8]  }
  0x9e   : > { %s533_s24 = sshll.u32 %s1374_s4, 2  ;;  %p792_p0 = scmp.ne.s32.totalorder %s1250_s0, %s791_s3 }
  0x9f   : > { %s384_s1 = sadd.s32 %s1375_s11, %s533_s24  ;;  %s795_s18 = sshll.u32 %s951_s10, 4  ;;  %s796_s18 = int_to_ptr.vmem [resolvable:$false] %s795_s18 }
  0xa0   : > { %559 = vmatpush3.bf16.msra.mxu0 %v558_v7  ;;  %s534_s28 = sshll.u32 %s384_s1, 7  ;;  %p793_p6 = pnand %p792_p0, %p1377_p13 }
  0xa1   : > { %s1248_s5 = scalar_lea.hbm %s1376_s29, %s534_s28  ;;  %s797_s7 = scalar_lea.vmem %s796_s18, 256 }
  0xa2   : > { %p794_p4 = pneg %p793_p6  ;;  %p798_p10 = scmp.lt.s32.totalorder %s1250_s0, %s796_s18 }
  0xa3   : > { %552 = vmatmul.mubr.msk.f32.vlgmr.msra.gmra.mrb[0].mxu0 %vm295_vm1, %v283_v8  ;;  %p799_p12 = scmp.lt.s32.totalorder %s797_s7, %s791_s3 }
  0xa5   : > { %p800_p7 = por %p799_p12, %p798_p10 }
  0xa7   : > { %p801_p9 = pnand %p800_p7, %p794_p4 }
 0x176   : > { %v365_v10 = vpop.f32.mrb[0].mxu0 }
 0x177   : > { %v366_v11 = vadd.f32 %v530_v9, %v365_v10  ;;  %v553_v12 = vpop.f32.mrb[1].mxu0 }
 0x179   : > { %370 = vst.msk [vmem:[%s282_s6] sm:$0xff] %vm369_vm2, %v366_v11 }
 0x17a   : > { %804 = shalt.err (!%p801_p9)
}
 0x17b   : > { %s805_s4 = scalar_lea.hbm %s1248_s5, 128  ;;  %s809_s21 = scalar_lea.hbm %s1376_s29, 1024 }
 0x17c   : > { %p806_p11 = scmp.ne.s32.totalorder %s1248_s5, %s805_s4  ;;  %p810_p2 = scmp.lt.u32.totalorder %s1248_s5, %s1376_s29 }
 0x17d   : > { %p811_p8 = scmp.lt.u32.totalorder %s809_s21, %s805_s4  ;;  %p813_p0 = scmp.lt.u32.totalorder %s805_s4, %s1248_s5 }
 0x17e   : > { %p807_p1 = pnand %p806_p11, %p1377_p13 }
 0x17f   : > { %p812_p5 = por %p811_p8, %p810_p2 }
 0x180   : > { %p808_p3 = pneg %p807_p1 }
 0x181   : > { %p814_p6 = por %p813_p0, %p812_p5 }
 0x183   : > { %p815_p4 = pnand %p814_p6, %p808_p3 }
 0x185   : > { %818 = shalt.err (!%p815_p4)
}
 0x186   : > { %566 = dma.vmem_to_hbm [thread:$0]  (%p1377_p13), %s1250_s0, 128, %s1248_s5, %s372_s9  }
 0x187 PF: > { %p583_p10 = scmp.ge.s32.totalorder %s941_s25, 2  ;;  %s400_s20 = sand.u32 1, %s889_s12  }
 0x188   : > { %p1378_p12 = scmp.ne.s32.totalorder %s1363_s26, 0  ;;  %s401_s28 = scalar_lea.sflag [#allocation4], %s400_s20 }
 0x18a   : > { %p579_p7 = pnand %p583_p10, %p1378_p12 }
 0x18c   : > { %884 = dma.done.wait (!%p579_p7), %s401_s28, 128  }
 0x18d   : > { %886 = vsyncadd (!%p579_p7), %s401_s28, 4294967168  ;;  %s22_s25 = sadd.s32 1, %s941_s25   ;;  %s1380_s0 = sld [smem:[#allocation19_spill]] }
 0x18e   : > { %p1278_p9 = scmp.ge.s32.totalorder %s22_s25, 10   ;;  %s1381_s8 = sld [smem:[#allocation12_spill]] }
 0x18f   : > { %s1382_s20 = sld [smem:[#allocation20_spill]]  ;;  %s1383_s26 = sld [smem:[#allocation15_spill]] }
 0x190   : > { %s1384_s30 = sld [smem:[#allocation16_spill]]  ;;  %s1385_s24 = sld [smem:[#allocation17_spill]] }
 0x191   : > { %s1386_s12 = smov %s893_s13  ;;  %s1387_s13 = smov %s897_s14 }
 0x192   : > { %s1388_s14 = smov %s1156_s22  ;;  %s1389_s15 = smov %s905_s16 }
 0x193   : > { %s1390_s16 = smov %s909_s17  ;;  %s1391_s17 = smov %s1380_s0 }
 0x194   : > { %s1392_s18 = smov %s917_s19  ;;  %s1393_s19 = smov %s1381_s8 }
 0x195   : > { %s1394_s21 = smov %s933_s23  ;;  %s1395_s22 = smov %s1383_s26 }
 0x196   : > { %s1396_s23 = smov %s1384_s30  ;;  %21 = sbr.rel (!%p1278_p9) target bundleno = 16 (0x10), region = 101 }
 0x19d   :  { %406 = vsyncpa [#allocation3], 1 }
 0x19e   :  { %408 = vsyncpa [#allocation3 + $0x1], 1 }
 0x19f   :  { %409 = vsyncpa [#allocation6], 1 }
 0x1a0   :  { %411 = vsyncpa [#allocation6 + $0x1], 1 }
 0x1a1   :  { %412 = vsyncpa [#allocation4], 1 }
 0x1a2   :  { %414 = vsyncpa [#allocation4 + $0x1], 1 }

// kernel: attention_layer_forward.8
= control target key start
LH: loop header
LB: loop body
LE: loop exit
PB: predicated region body
PF: predicated region fallthrough
CT: control target
= control target key end

     0   :  { %s1770_s0 = inlined_call_operand.hbm [shape: f32[2,4,8,8], index: 0, kind: input, shape index: {}]   ;;  %s1771_s1 = inlined_call_operand.hbm [shape: f32[2,4,8,8], index: 1, kind: input, shape index: {}]   ;;  %s1772_s2 = inlined_call_operand.hbm [shape: f32[2,4,8,8], index: 2, kind: input, shape index: {}]   ;;  %s1773_s3 = inlined_call_operand.hbm [shape: f32[2,4,8,8], index: 3, kind: input, shape index: {}]   ;;  %s1774_s4 = inlined_call_operand.hbm [shape: f32[8,8], index: 4, kind: input, shape index: {}]   ;;  %s1775_s5 = inlined_call_operand.hbm [shape: f32[2,4,8,8], index: 5, kind: output, shape index: {0}]   ;;  %s1776_s6 = inlined_call_operand.hbm [shape: f32[2,4,8,8], index: 6, kind: output, shape index: {1}]  }
   0x1   :  { %1794 = sst [smem:[#allocation28_spill]] %s1770_s0 }
   0x2   :  { %1795 = sst [smem:[#allocation29_spill]] %s1771_s1 }
   0x3   :  { %1796 = sst [smem:[#allocation30_spill]] %s1774_s4 }
   0x4   :  { %1797 = sst [smem:[#allocation31_spill]] %s1775_s5 }
   0x5   :  { %12 = vsyncpa [#allocation3], 0 }
   0x6   :  { %14 = vsyncpa [#allocation3 + $0x1], 0 }
   0x7   :  { %15 = vsyncpa [#allocation6], 0 }
   0x8   :  { %17 = vsyncpa [#allocation6 + $0x1], 0 }
   0x9   :  { %18 = vsyncpa [#allocation9], 0 }
   0xa   :  { %20 = vsyncpa [#allocation9 + $0x1], 0 }
   0xb   :  { %21 = vsyncpa [#allocation4], 0 }
   0xc   :  { %23 = vsyncpa [#allocation4 + $0x1], 0 }
   0xd   :  { %24 = vsyncpa [#allocation13], 0 }
   0xe   :  { %26 = vsyncpa [#allocation13 + $0x1], 0  ;;  %s1373_s21 = smov 0   ;;  %s1375_s22 = smov 0  }
   0xf   :  { %s1377_s23 = smov 0   ;;  %s1379_s24 = smov 0  }
  0x10   :  { %s1381_s25 = smov 0   ;;  %s1383_s26 = smov 0  }
  0x11   :  { %s1385_s27 = smov 0   ;;  %s1387_s28 = smov 0  }
  0x12 LB: > { %1798 = sst [smem:[#allocation20_spill]] %s1299_s21  ;;  %s1414_s29 = sadd.s32 4294967295, %s1327_s28   ;;  %s1327_s28 = sphi %s1387_s28, %s32_s28   ;;  %s1323_s27 = sphi %s1385_s27, %s1840_s27   ;;  %s1319_s26 = sphi %s1383_s26, %s1839_s26   ;;  %s1315_s25 = sphi %s1381_s25, %s1838_s25   ;;  %s1311_s24 = sphi %s1379_s24, %s1837_s24   ;;  %s1307_s23 = sphi %s1377_s23, %s1836_s23   ;;  %s1303_s22 = sphi %s1375_s22, %s1842_s22   ;;  %s1299_s21 = sphi %s1373_s21, %s1841_s21  }
  0x13   : > { %1799 = sst [smem:[#allocation21_spill]] %s1307_s23  ;;  %s873_s30 = sadd.s32 4294967294, %s1327_s28  }
  0x14   : > { %1800 = sst [smem:[#allocation22_spill]] %s1319_s26  ;;  %p69_p0 = scmp.ne.s32.totalorder %s1307_s23, %s1303_s22 }
  0x15   : > { %1801 = sst [smem:[#allocation23_spill]] %s1323_s27  ;;  %p70_p1 = scmp.eq.s32.totalorder %s1327_s28, 0 }
  0x16   : > { %p75_p2 = scmp.ne.s32.totalorder %s1303_s22, %s1299_s21  ;;  %p1779_p3 = scmp.eq.s32.totalorder %s1414_s29, 0 }
  0x17   : > { %p215_p4 = scmp.eq.s32.totalorder %s1414_s29, 7  ;;  %p1425_p5 = por %p70_p1, %p69_p0 }
  0x18   : > { %p221_p6 = scmp.eq.s32.totalorder %s873_s30, 7  ;;  %p1431_p7 = por %p1779_p3, %p75_p2 }
  0x19   : > { %s1802_s8 = scalar_select %p1425_p5, 1, 0 }
  0x1a   : > { %s1803_s9 = scalar_select %p1431_p7, 1, 0 }
  0x1b   : > { %p1435_p8 = por %p215_p4, %p69_p0  ;;  %p1439_p9 = por %p221_p6, %p75_p2 }
  0x1c   : > { %p874_p10 = scmp.ge.s32.totalorder %s1327_s28, 1  ;;  %p258_p11 = scmp.lt.s32.totalorder %s1327_s28, 9 }
  0x1d   : > { %s1804_s10 = scalar_select %p1435_p8, 1, 0 }
  0x1e   : > { %s1805_s11 = scalar_select %p1439_p9, 1, 0 }
  0x1f   : > { %p1445_p12 = pnand %p874_p10, %p258_p11  ;;  %s1329_s13 = smov [#allocation10]  }
  0x20   : > { %1806 = sst [smem:[#allocation24_spill]] %s1805_s11  ;;  %s273_s14 = sshll.u32 %s1329_s13, 4  ;;  %s274_s14 = int_to_ptr.vmem [resolvable:$true] %s273_s14 }
  0x21   : > { %s1807_s12 = scalar_select %p1445_p12, 1, 0 }
  0x22   : > { %p938_p13 = pneg %p1445_p12  ;;  %s47_s16 = sadd.s32 1, %s1319_s26 }
  0x23   : > { %p1458_p1 = scmp.ge.s32.totalorder %s47_s16, 4  ;;  %s51_s18 = sadd.s32 1, %s1323_s27 }
  0x24   : > { %p1453_p0 = pnand %p938_p13, %p1779_p3  ;;  %s1810_s4 = sld [smem:[#allocation30_spill]] }
  0x25   : > { %s1809_s17 = scalar_select %p1458_p1, 1, 0 }
  0x26   : > { %p1039_p6 = pneg %p1453_p0 }
  0x2a   : > { %s1037_s30 = scalar_lea.hbm %s1810_s4, 128 }
  0x2b   : > { %p1038_p4 = scmp.ne.s32.totalorder %s1810_s4, %s1037_s30  ;;  %p1044_p13 = scmp.lt.u32.totalorder %s1037_s30, %s1810_s4 }
  0x2d   : > { %p1040_p10 = pnand %p1039_p6, %p1038_p4 }
  0x2f   : > { %p1041_p11 = pneg %p1040_p10 }
  0x31   : > { %p1046_p3 = pnand %p1044_p13, %p1041_p11 }
  0x33   : > { %1049 = shalt.err (!%p1046_p3)
}
  0x34   : > { %s1050_s5 = scalar_lea.vmem %s274_s14, 128  ;;  %p1058_p7 = scmp.lt.s32.totalorder %s274_s14, %s274_s14 }
  0x35   : > { %p1051_p2 = scmp.ne.s32.totalorder %s274_s14, %s1050_s5  ;;  %p1059_p12 = scmp.lt.s32.totalorder %s1050_s5, %s1050_s5 }
  0x37   : > { %p1053_p9 = pnand %p1051_p2, %p1039_p6  ;;  %p1060_p5 = por %p1059_p12, %p1058_p7 }
  0x39   : > { %p1054_p8 = pneg %p1053_p9 }
  0x3b   : > { %p1061_p1 = pnand %p1060_p5, %p1054_p8 }
  0x3d   : > { %1064 = shalt.err (!%p1061_p1)
}
  0x3e   : > { %941 = dma.hbm_to_vmem [thread:$0]  (!%p1453_p0), %s1810_s4, 128, %s274_s14, [#allocation9]  }
  0x3f   : > { %p1811_p3 = scmp.ne.s32.totalorder %s1809_s17, 0  ;;  %s1785_s21 = sand.u32 1, %s1307_s23  }
  0x40   : > { %s1492_s11 = sshll.u32 %s1785_s21, 3  ;;  %s878_s15 = sshll.u32 %s1323_s27, 2 }
  0x41   : > { %s1844_s16 = smov (%p1811_p3, %s47_s16), 0  ;;  %s1846_s18 = smov (!%p1811_p3, %s51_s18), %s1323_s27 }
  0x42   : > { %1812 = sst [smem:[#allocation25_spill]] %s1844_s16  ;;  %s56_s5 = ssub.s32 %s1319_s26, %s1844_s16 }
  0x43   : > { %p53_p5 = scmp.ge.s32.totalorder %s1846_s18, 2  ;;  %p1813_p7 = scmp.ne.s32.totalorder %s1802_s8, 0 }
  0x44   : > { %p1814_p8 = scmp.lt.s32.totalorder %s1327_s28, 8  ;;  %s294_s17 = sadd.s32 %s1319_s26, %s878_s15 }
  0x45   : > { %s1848_s18 = smov (%p53_p5, %s1846_s18), 0  ;;  %s1508_s30 = sshll.u32 %s294_s17, 7 }
  0x46   : > { %p1499_p9 = pnand %p1814_p8, %p1813_p7  ;;  %1816 = sst [smem:[#allocation26_spill]] %s1848_s18 }
  0x47   : > { %s55_s20 = ssub.s32 %s1323_s27, %s1848_s18  ;;  %s1788_s7 = sand.u32 1, %s1327_s28  }
  0x48   : > { %s1815_s14 = scalar_select %p1499_p9, 1, 0 }
  0x49   : > { %s57_s13 = sor.u32 %s56_s5, %s55_s20  ;;  %s1817_s1 = sld [smem:[#allocation29_spill]] }
  0x4a   : > { %p60_p12 = scmp.eq.s32.totalorder %s57_s13, 0  ;;  %s1818_s4 = sadd.s32 1, %s1307_s23 }
  0x4b   : > { %s309_s15 = scalar_lea.vmem [#allocation5], %s1492_s11  ;;  %s1527_s5 = scalar_lea.sflag [#allocation6], %s1788_s7 }
  0x4c   : > { %s1520_s16 = scalar_select %p60_p12, %s1307_s23, %s1818_s4  }
  0x4d   : > { %s318_s18 = sshll.u32 %s309_s15, 4  ;;  %p1533_p1 = pneg %p1499_p9  ;;  %s1523_s18 = int_to_ptr.vmem [resolvable:$true] %s318_s18 }
  0x4e   : > { %1819 = sst [smem:[#allocation27_spill]] %s1520_s16 }
  0x4f   : > { %s1515_s8 = scalar_lea.hbm %s1817_s1, %s1508_s30  ;;  %s1070_s13 = scalar_lea.hbm %s1817_s1, 1024 }
  0x50   : > { %s1065_s17 = scalar_lea.hbm %s1515_s8, 128  ;;  %p1071_p6 = scmp.lt.u32.totalorder %s1515_s8, %s1817_s1 }
  0x51   : > { %p1066_p0 = scmp.ne.s32.totalorder %s1515_s8, %s1065_s17  ;;  %p1072_p10 = scmp.lt.u32.totalorder %s1070_s13, %s1065_s17 }
  0x52   : > { %p1074_p13 = scmp.lt.u32.totalorder %s1065_s17, %s1515_s8 }
  0x53   : > { %p1068_p2 = pnand %p1533_p1, %p1066_p0  ;;  %p1073_p11 = por %p1072_p10, %p1071_p6 }
  0x55   : > { %p1069_p4 = pneg %p1068_p2  ;;  %p1075_p3 = por %p1074_p13, %p1073_p11 }
  0x57   : > { %p1076_p5 = pnand %p1075_p3, %p1069_p4 }
  0x59   : > { %1079 = shalt.err (!%p1076_p5)
}
  0x5a   : > { %s1080_s7 = scalar_lea.vmem %s1523_s18, 128  ;;  %s1330_s4 = smov [#allocation5]  }
  0x5b   : > { %p1081_p7 = scmp.ne.s32.totalorder %s1523_s18, %s1080_s7  ;;  %s1085_s20 = sshll.u32 %s1330_s4, 4  ;;  %s1086_s20 = int_to_ptr.vmem [resolvable:$false] %s1085_s20 }
  0x5c   : > { %s1087_s19 = scalar_lea.vmem %s1086_s20, 256  ;;  %p1088_p0 = scmp.lt.s32.totalorder %s1523_s18, %s1086_s20 }
  0x5d   : > { %p1083_p8 = pnand %p1081_p7, %p1533_p1  ;;  %p1089_p2 = scmp.lt.s32.totalorder %s1087_s19, %s1080_s7 }
  0x5f   : > { %p1084_p12 = pneg %p1083_p8  ;;  %p1090_p6 = por %p1089_p2, %p1088_p0 }
  0x61   : > { %p1091_p10 = pnand %p1090_p6, %p1084_p12 }
  0x63   : > { %1094 = shalt.err (!%p1091_p10)
}
  0x64   : > { %948 = dma.hbm_to_vmem [thread:$0]  (!%p1499_p9), %s1515_s8, 128, %s1523_s18, %s1527_s5  }
  0x65   : > { %s1821_s0 = sld [smem:[#allocation28_spill]]  ;;  %s288_s7 = scalar_lea.vmem [#allocation2], %s1492_s11 }
  0x66   : > { %s298_s4 = sshll.u32 %s288_s7, 4  ;;  %s1570_s1 = scalar_lea.hbm %s1772_s2, %s1508_s30  ;;  %s1564_s4 = int_to_ptr.vmem [resolvable:$true] %s298_s4 }
  0x67   : > { %s1822_s27 = sand.u32 1, %s1307_s23  }
  0x68   : > { %s285_s18 = scalar_lea.sflag [#allocation3], %s1822_s27 }
  0x6b   : > { %s1561_s15 = scalar_lea.hbm %s1821_s0, %s1508_s30  ;;  %s1100_s26 = scalar_lea.hbm %s1821_s0, 1024 }
  0x6c   : > { %s1095_s8 = scalar_lea.hbm %s1561_s15, 128  ;;  %p1101_p3 = scmp.lt.u32.totalorder %s1561_s15, %s1821_s0 }
  0x6d   : > { %p1096_p4 = scmp.ne.s32.totalorder %s1561_s15, %s1095_s8  ;;  %p1102_p5 = scmp.lt.u32.totalorder %s1100_s26, %s1095_s8 }
  0x6e   : > { %p1104_p8 = scmp.lt.u32.totalorder %s1095_s8, %s1561_s15 }
  0x6f   : > { %p1098_p11 = pnand %p1096_p4, %p1533_p1  ;;  %p1103_p7 = por %p1102_p5, %p1101_p3 }
  0x71   : > { %p1099_p13 = pneg %p1098_p11  ;;  %p1105_p12 = por %p1104_p8, %p1103_p7 }
  0x73   : > { %p1106_p0 = pnand %p1105_p12, %p1099_p13 }
  0x75   : > { %1109 = shalt.err (!%p1106_p0)
}
  0x76   : > { %s1110_s27 = scalar_lea.vmem %s1564_s4, 128  ;;  %s1331_s20 = smov [#allocation2]  }
  0x77   : > { %p1111_p2 = scmp.ne.s32.totalorder %s1564_s4, %s1110_s27  ;;  %s1115_s19 = sshll.u32 %s1331_s20, 4  ;;  %s1116_s19 = int_to_ptr.vmem [resolvable:$false] %s1115_s19 }
  0x78   : > { %s1117_s16 = scalar_lea.vmem %s1116_s19, 256  ;;  %p1118_p4 = scmp.lt.s32.totalorder %s1564_s4, %s1116_s19 }
  0x79   : > { %p1113_p6 = pnand %p1111_p2, %p1533_p1  ;;  %p1119_p11 = scmp.lt.s32.totalorder %s1117_s16, %s1110_s27 }
  0x7b   : > { %p1114_p10 = pneg %p1113_p6  ;;  %p1120_p3 = por %p1119_p11, %p1118_p4 }
  0x7d   : > { %p1121_p5 = pnand %p1120_p3, %p1114_p10 }
  0x7f   : > { %1124 = shalt.err (!%p1121_p5)
}
  0x80   : > { %945 = dma.hbm_to_vmem [thread:$0]  (!%p1499_p9), %s1561_s15, 128, %s1564_s4, %s285_s18  }
  0x81   : > { %s329_s26 = scalar_lea.vmem [#allocation7], %s1492_s11  ;;  %s1600_s7 = scalar_lea.hbm %s1773_s3, %s1508_s30 }
  0x82   : > { %s338_s8 = sshll.u32 %s329_s26, 4  ;;  %s1125_s27 = scalar_lea.hbm %s1570_s1, 128  ;;  %s339_s8 = int_to_ptr.vmem [resolvable:$true] %s338_s8 }
  0x83   : > { %p1126_p13 = scmp.ne.s32.totalorder %s1570_s1, %s1125_s27  ;;  %s1130_s16 = scalar_lea.hbm %s1772_s2, 1024 }
  0x84   : > { %p1131_p12 = scmp.lt.u32.totalorder %s1570_s1, %s1772_s2  ;;  %p1132_p0 = scmp.lt.u32.totalorder %s1130_s16, %s1125_s27 }
  0x85   : > { %p1128_p7 = pnand %p1126_p13, %p1533_p1  ;;  %p1134_p6 = scmp.lt.u32.totalorder %s1125_s27, %s1570_s1 }
  0x86   : > { %p1133_p2 = por %p1132_p0, %p1131_p12 }
  0x87   : > { %p1129_p8 = pneg %p1128_p7 }
  0x88   : > { %p1135_p10 = por %p1134_p6, %p1133_p2 }
  0x8a   : > { %p1136_p4 = pnand %p1135_p10, %p1129_p8 }
  0x8c   : > { %1139 = shalt.err (!%p1136_p4)
}
  0x8d   : > { %s1140_s30 = scalar_lea.vmem %s339_s8, 128  ;;  %s1332_s15 = smov [#allocation7]  }
  0x8e   : > { %p1141_p11 = scmp.ne.s32.totalorder %s339_s8, %s1140_s30  ;;  %s1145_s4 = sshll.u32 %s1332_s15, 4  ;;  %s1146_s4 = int_to_ptr.vmem [resolvable:$false] %s1145_s4 }
  0x8f   : > { %s1147_s18 = scalar_lea.vmem %s1146_s4, 256  ;;  %p1148_p13 = scmp.lt.s32.totalorder %s339_s8, %s1146_s4 }
  0x90   : > { %p1143_p3 = pnand %p1141_p11, %p1533_p1  ;;  %p1149_p7 = scmp.lt.s32.totalorder %s1147_s18, %s1140_s30 }
  0x92   : > { %p1144_p5 = pneg %p1143_p3  ;;  %p1150_p9 = por %p1149_p7, %p1148_p13 }
  0x94   : > { %p1151_p0 = pnand %p1150_p9, %p1144_p5 }
  0x96   : > { %1154 = shalt.err (!%p1151_p0)
}
  0x97   : > { %p1823_p12 = scmp.ne.s32.totalorder %s1815_s14, 0  ;;  %s349_s0 = scalar_lea.vmem [#allocation8], %s1492_s11 }
  0x98   : > { %s359_s23 = sshll.u32 %s349_s0, 4  ;;  %s1824_s26 = sand.u32 1, %s1327_s28   ;;  %s360_s23 = int_to_ptr.vmem [resolvable:$true] %s359_s23 }
  0x99   : > { %951 = dma.hbm_to_vmem [thread:$0]  (!%p1823_p12), %s1570_s1, 128, %s339_s8, %s1527_s5  }
  0x9a   : > { %s346_s17 = scalar_lea.sflag [#allocation9], %s1824_s26  ;;  %s1155_s13 = scalar_lea.hbm %s1600_s7, 128 }
  0x9b   : > { %p1156_p9 = scmp.ne.s32.totalorder %s1600_s7, %s1155_s13  ;;  %s1160_s19 = scalar_lea.hbm %s1773_s3, 1024 }
  0x9c   : > { %p1161_p6 = scmp.lt.u32.totalorder %s1600_s7, %s1773_s3  ;;  %p1162_p10 = scmp.lt.u32.totalorder %s1160_s19, %s1155_s13 }
  0x9d   : > { %p1158_p8 = pnand %p1156_p9, %p1533_p1  ;;  %p1164_p11 = scmp.lt.u32.totalorder %s1155_s13, %s1600_s7 }
  0x9e   : > { %p1163_p4 = por %p1162_p10, %p1161_p6 }
  0x9f   : > { %p1159_p2 = pneg %p1158_p8 }
  0xa0   : > { %p1165_p3 = por %p1164_p11, %p1163_p4 }
  0xa2   : > { %p1166_p5 = pnand %p1165_p3, %p1159_p2 }
  0xa4   : > { %1169 = shalt.err (!%p1166_p5)
}
  0xa5   : > { %s1170_s1 = scalar_lea.vmem %s360_s23, 128  ;;  %s1333_s11 = smov [#allocation8]  }
  0xa6   : > { %p1171_p13 = scmp.ne.s32.totalorder %s360_s23, %s1170_s1  ;;  %s1175_s5 = sshll.u32 %s1333_s11, 4  ;;  %s1176_s5 = int_to_ptr.vmem [resolvable:$false] %s1175_s5 }
  0xa7   : > { %s1177_s8 = scalar_lea.vmem %s1176_s5, 256  ;;  %p1178_p9 = scmp.lt.s32.totalorder %s360_s23, %s1176_s5 }
  0xa8   : > { %p1173_p7 = pnand %p1171_p13, %p1533_p1  ;;  %p1179_p8 = scmp.lt.s32.totalorder %s1177_s8, %s1170_s1 }
  0xaa   : > { %p1174_p0 = pneg %p1173_p7  ;;  %p1180_p12 = por %p1179_p8, %p1178_p9 }
  0xac   : > { %p1181_p6 = pnand %p1180_p12, %p1174_p0 }
  0xae   : > { %1184 = shalt.err (!%p1181_p6)
}
  0xaf   : > { %p1825_p10 = scmp.ne.s32.totalorder %s1815_s14, 0  ;;  %p1826_p2 = scmp.ne.s32.totalorder %s1807_s12, 0 }
  0xb0   : > { %s1643_s21 = sand.u32 (!%p1826_p2), 1, %s1303_s22   ;;  %p1827_p1 = scmp.ne.s32.totalorder (!%p1826_p2), %s1803_s9, 0 }
  0xb1   : > { %954 = dma.hbm_to_vmem [thread:$0]  (!%p1825_p10), %s1600_s7, 128, %s360_s23, %s346_s17  }
  0xb2   : > { %368 = sbr.rel (%p1826_p2) target bundleno = 956 (0x3bc), region = 40  ;;  %s1646_s15 = sshll.u32 (!%p1826_p2), %s1643_s21, 3 }
  0xb3   : > { %s371_s4 = scalar_lea.sflag (!%p1826_p2), [#allocation3], %s1643_s21  ;;  %s374_s18 = scalar_lea.vmem (!%p1826_p2), [#allocation2], %s1646_s15 }
  0xb9   : > { %1274 = dma.done.wait (%p1827_p1), %s371_s4, 128  }
  0xba   : > { %1276 = vsyncadd (%p1827_p1), %s371_s4, 4294967168  ;;  %s379_s12 = sand.u32 1, %s1414_s29   ;;  %s383_s7 = scalar_lea.vmem [#allocation5], %s1646_s15 }
  0xbb   : > { %s380_s14 = scalar_lea.sflag [#allocation6], %s379_s12 }
  0xbc   : > { %1278 = dma.done.wait (%p1827_p1), %s380_s14, 256  }
  0xbd   : > { %1280 = vsyncadd (%p1827_p1), %s380_s14, 4294967040  ;;  %s392_s0 = scalar_lea.vmem [#allocation7], %s1646_s15  ;;  %s398_s23 = scalar_lea.sflag [#allocation9], %s379_s12 }
  0xbe   : > { %s401_s26 = scalar_lea.vmem [#allocation8], %s1646_s15 }
  0xbf   : > { %1282 = dma.done.wait (%p1827_p1), %s398_s23, 128  }
  0xc0   : > { %1284 = vsyncadd (%p1827_p1), %s398_s23, 4294967168  ;;  %p1828_p12 = scmp.eq.s32.totalorder %s1414_s29, 0 }
  0xc2   : > { %1286 = dma.done.wait (%p1828_p12), [#allocation9], 128   ;;  %p1829_p4 = pmov %p1828_p12 }
  0xc3   : > { %v1334_v0 = vmov 0.0   ;;  %vm1335_vm0 = vmmov 0   ;;  %vm458_vm1 = vcmask 64512   ;;  %v456_v1 = vld [vmem:[%s383_s7] sm:$0xff]  ;;  %v454_v2 = vld [vmem:[%s374_s18] sm:$0xff]  ;;  %s453_s29 = scalar_lea.vmem [#allocation12], %s1646_s15 }
  0xc4   : > { %1288 = vsyncadd (%p1829_p4), [#allocation9], 4294967168  ;;  %912 = vmatprep.subr.mxu0 %v1334_v0  ;;  %914 = vmatprep.mubr.msk.f32.mxu0 %vm1335_vm0, %v1334_v0  ;;  %v455_v3 = vmul.f32 0.35355338, %v454_v2  ;;  %v535_v4 = vld [vmem:[#allocation10] sm:$0xff]  ;;  %v457_v5 = vld [vmem:[%s401_s26] sm:$0xff] }
  0xc5   : > { %917 = vmatprep.subr.mxu1 %v1334_v0  ;;  %919 = vmatprep.mubr.msk.f32.mxu1 %vm1335_vm0, %v1334_v0  ;;  %vm536_vm2 = vcmp.ne.f32.partialorder %v535_v4, 0.0  ;;  %v549_v16 = vld [vmem:[%s392_s0] sm:$0xff]  ;;  %s902_s9 = sshll.u32 %s1315_s25, 2  ;;  %s663_s16 = sshll.u32 %s453_s29, 4  ;;  %s664_s16 = int_to_ptr.vmem [resolvable:$true] %s663_s16 }
  0xc6   : > { %913 = vmatpush3.xpose.msk.msra.mxu0 %vm458_vm1, %v456_v1  ;;  %918 = vmatpush3.msra.mxu1 %v549_v16  ;;  %s1681_s17 = sadd.s32 %s1311_s24, %s902_s9  ;;  %s631_s30 = scalar_lea.sflag [#allocation13], %s1643_s21 }
  0xc7   : > { %s903_s13 = sshll.u32 %s1681_s17, 7  ;;  %s1185_s1 = scalar_lea.vmem %s664_s16, 128 }
  0xc8   : > { %s1689_s19 = scalar_lea.hbm %s1776_s6, %s903_s13  ;;  %p1186_p11 = scmp.ne.s32.totalorder %s664_s16, %s1185_s1 }
  0xc9   : > { %915 = vmatmul.mubr.msk.f32.vlgmr.msra.gmra.mrb[0].mxu0 %vm458_vm1, %v455_v3  ;;  %p1830_p3 = scmp.ne.s32.totalorder %s1804_s10, 0  ;;  %s1336_s25 = smov [#allocation12]  }
  0xca   : > { %s1189_s24 = sshll.u32 %s1336_s25, 4  ;;  %s1190_s24 = int_to_ptr.vmem [resolvable:$false] %s1189_s24 }
  0xcb   : > { %p1187_p5 = pnand %p1186_p11, %p1830_p3  ;;  %s1191_s11 = scalar_lea.vmem %s1190_s24, 256 }
  0xcc   : > { %p1192_p7 = scmp.lt.s32.totalorder %s664_s16, %s1190_s24  ;;  %p1193_p0 = scmp.lt.s32.totalorder %s1191_s11, %s1185_s1 }
  0xcd   : > { %p1188_p13 = pneg %p1187_p5 }
  0xce   : > { %p1194_p9 = por %p1193_p0, %p1192_p7 }
  0xd0   : > { %p1195_p8 = pnand %p1194_p9, %p1188_p13 }
 0x19c   : > { %v531_v6 = vpop.f32.mrb[0].mxu0 }
 0x19d   : > { %v532_v7 = vadd.f32 %v531_v6, %v457_v5  ;;  %v916_v8 = vpop.f32.mrb[1].mxu0 }
 0x19f   : > { %v537_v9 = vsel %vm536_vm2, -1e+30, %v532_v7 }
 0x1a0   : > { %v538_v10 = vsel %vm458_vm1, %v537_v9, -inf }
 0x1a1   : > { %539 = vmax.xlane.f32.xlu0 %v538_v10 }
 0x22e   : > { %v540_v11 = vpop.xlane.xlu0 %539 }
 0x22f   : > { %v541_v12 = vsub.f32 %v537_v9, %v540_v11 }
 0x231   : > { %v542_v13 = vmul.f32 1.442695, %v541_v12 }
 0x233   : > { %1033 = vpow2.f32 %v542_v13 }
 0x23d   : > { %v1034_v14 = vpop.eup %1033 }
 0x23e   : > { %v544_v15 = vsel %vm458_vm1, %v1034_v14, 0.0 }
 0x23f   : > { %545 = vadd.xlane.f32.xlu0 %v544_v15 }
 0x2cc   : > { %v546_v17 = vpop.xlane.xlu0 %545 }
 0x2cd   : > { %1035 = vrcp.f32 %v546_v17 }
 0x2d7   : > { %v1036_v18 = vpop.eup %1035 }
 0x2d8   : > { %v548_v19 = vmul.f32 %v1036_v18, %v1034_v14 }
 0x2da   : > { %920 = vmatmul.mubr.msk.f32.vlgmr.msra.gmra.mrb[0].mxu1 %vm458_vm1, %v548_v19  ;;  %624 = vst.msk [vmem:[%s453_s29] sm:$0xff] %vm458_vm1, %v548_v19 }
 0x2db   : > { %1198 = shalt.err (!%p1195_p8)
}
 0x2dc   : > { %s1199_s5 = scalar_lea.hbm %s1689_s19, 128  ;;  %s1203_s18 = scalar_lea.hbm %s1776_s6, 1024 }
 0x2dd   : > { %p1200_p6 = scmp.ne.s32.totalorder %s1689_s19, %s1199_s5  ;;  %p1204_p1 = scmp.lt.u32.totalorder %s1689_s19, %s1776_s6 }
 0x2de   : > { %p1205_p12 = scmp.lt.u32.totalorder %s1203_s18, %s1199_s5  ;;  %p1207_p11 = scmp.lt.u32.totalorder %s1199_s5, %s1689_s19 }
 0x2df   : > { %p1201_p10 = pnand %p1200_p6, %p1830_p3 }
 0x2e0   : > { %p1206_p4 = por %p1205_p12, %p1204_p1 }
 0x2e1   : > { %p1202_p2 = pneg %p1201_p10 }
 0x2e2   : > { %p1208_p5 = por %p1207_p11, %p1206_p4 }
 0x2e4   : > { %p1209_p13 = pnand %p1208_p5, %p1202_p2 }
 0x2e6   : > { %1212 = shalt.err (!%p1209_p13)
}
 0x2e7   : > { %935 = dma.vmem_to_hbm [thread:$0]  (%p1830_p3), %s664_s16, 128, %s1689_s19, %s631_s30  }
 0x2e8   : > { %s446_s7 = scalar_lea.vmem [#allocation11], %s1646_s15  ;;  %s1831_s29 = sld [smem:[#allocation31_spill]] }
 0x2e9   : > { %s647_s0 = sshll.u32 %s446_s7, 4  ;;  %s626_s27 = scalar_lea.sflag [#allocation4], %s1643_s21  ;;  %s1717_s0 = int_to_ptr.vmem [resolvable:$true] %s647_s0 }
 0x2ea   : > { %s1213_s20 = scalar_lea.vmem %s1717_s0, 128  ;;  %s1337_s15 = smov [#allocation11]  }
 0x2eb   : > { %p1214_p7 = scmp.ne.s32.totalorder %s1717_s0, %s1213_s20  ;;  %s1217_s17 = sshll.u32 %s1337_s15, 4  ;;  %s1218_s17 = int_to_ptr.vmem [resolvable:$false] %s1217_s17 }
 0x2ec   : > { %p1220_p8 = scmp.lt.s32.totalorder %s1717_s0, %s1218_s17 }
 0x2ed   : > { %p1215_p0 = pnand %p1214_p7, %p1830_p3 }
 0x2ee   : > { %s1715_s9 = scalar_lea.hbm %s1831_s29, %s903_s13  ;;  %s1219_s13 = scalar_lea.vmem %s1218_s17, 256 }
 0x2ef   : > { %p1216_p9 = pneg %p1215_p0  ;;  %p1221_p6 = scmp.lt.s32.totalorder %s1219_s13, %s1213_s20 }
 0x2f1   : > { %p1222_p10 = por %p1221_p6, %p1220_p8 }
 0x2f3   : > { %p1223_p2 = pnand %p1222_p10, %p1216_p9 }
 0x3ad   : > { %v619_v20 = vpop.f32.mrb[0].mxu1 }
 0x3ae   : > { %623 = vst.msk [vmem:[%s446_s7] sm:$0xff] %vm458_vm1, %v619_v20  ;;  %v921_v21 = vpop.f32.mrb[1].mxu1 }
 0x3af   : > { %1226 = shalt.err (!%p1223_p2)
}
 0x3b0   : > { %s1227_s21 = scalar_lea.hbm %s1715_s9, 128  ;;  %s1231_s30 = scalar_lea.hbm %s1831_s29, 1024 }
 0x3b1   : > { %p1228_p1 = scmp.ne.s32.totalorder %s1715_s9, %s1227_s21  ;;  %p1232_p11 = scmp.lt.u32.totalorder %s1715_s9, %s1831_s29 }
 0x3b2   : > { %p1233_p5 = scmp.lt.u32.totalorder %s1231_s30, %s1227_s21  ;;  %p1235_p7 = scmp.lt.u32.totalorder %s1227_s21, %s1715_s9 }
 0x3b3   : > { %p1229_p12 = pnand %p1228_p1, %p1830_p3 }
 0x3b4   : > { %p1234_p13 = por %p1233_p5, %p1232_p11 }
 0x3b5   : > { %p1230_p4 = pneg %p1229_p12 }
 0x3b6   : > { %p1236_p0 = por %p1235_p7, %p1234_p13 }
 0x3b8   : > { %p1237_p9 = pnand %p1236_p0, %p1230_p4 }
 0x3ba   : > { %1240 = shalt.err (!%p1237_p9)
}
 0x3bb   : > { %934 = dma.vmem_to_hbm [thread:$0]  (%p1830_p3), %s1717_s0, 128, %s1715_s9, %s626_s27  }
 0x3bc PF: > { %s1832_s24 = sld [smem:[#allocation20_spill]]  ;;  %s1833_s11 = sld [smem:[#allocation24_spill]] }
 0x3bd   : > { %p965_p8 = scmp.ge.s32.totalorder %s1327_s28, 2 }
 0x3c2   : > { %s675_s5 = sand.u32 1, %s1832_s24   ;;  %p1834_p6 = scmp.ne.s32.totalorder %s1833_s11, 0 }
 0x3c3   : > { %s676_s8 = scalar_lea.sflag [#allocation4], %s675_s5 }
 0x3c4   : > { %p956_p10 = pnand %p965_p8, %p1834_p6 }
 0x3c6   : > { %1290 = dma.done.wait (!%p956_p10), %s676_s8, 128  }
 0x3c7   : > { %1292 = vsyncadd (!%p956_p10), %s676_s8, 4294967168  ;;  %s685_s4 = scalar_lea.sflag [#allocation13], %s675_s5 }
 0x3c8   : > { %1294 = dma.done.wait (!%p956_p10), %s685_s4, 128  }
 0x3c9   : > { %1296 = vsyncadd (!%p956_p10), %s685_s4, 4294967168  ;;  %s32_s28 = sadd.s32 1, %s1327_s28   ;;  %s1835_s10 = sld [smem:[#allocation21_spill]] }
 0x3ca   : > { %p29_p2 = scmp.ge.s32.totalorder %s32_s28, 10   ;;  %s1836_s23 = sld [smem:[#allocation27_spill]] }
 0x3cb   : > { %s1837_s24 = sld [smem:[#allocation22_spill]]  ;;  %s1838_s25 = sld [smem:[#allocation23_spill]] }
 0x3cc   : > { %s1839_s26 = sld [smem:[#allocation25_spill]]  ;;  %s1840_s27 = sld [smem:[#allocation26_spill]] }
 0x3cd   : > { %s1841_s21 = smov %s1303_s22  ;;  %31 = sbr.rel (!%p29_p2) target bundleno = 18 (0x12), region = 144 }
 0x3cf   : > { %s1842_s22 = smov %s1835_s10 }
 0x3d4   :  { %690 = vsyncpa [#allocation3], 1 }
 0x3d5   :  { %692 = vsyncpa [#allocation3 + $0x1], 1 }
 0x3d6   :  { %693 = vsyncpa [#allocation6], 1 }
 0x3d7   :  { %695 = vsyncpa [#allocation6 + $0x1], 1 }
 0x3d8   :  { %696 = vsyncpa [#allocation9], 1 }
 0x3d9   :  { %698 = vsyncpa [#allocation9 + $0x1], 1 }
 0x3da   :  { %699 = vsyncpa [#allocation4], 1 }
 0x3db   :  { %701 = vsyncpa [#allocation4 + $0x1], 1 }
 0x3dc   :  { %702 = vsyncpa [#allocation13], 1 }
 0x3dd   :  { %704 = vsyncpa [#allocation13 + $0x1], 1 }

// kernel: attention_layer_forward.9
= control target key start
LH: loop header
LB: loop body
LE: loop exit
PB: predicated region body
PF: predicated region fallthrough
CT: control target
= control target key end

     0   :  { %s1311_s0 = inlined_call_operand.hbm [shape: f32[2,4,8,8], index: 0, kind: input, shape index: {}]   ;;  %s1312_s1 = inlined_call_operand.hbm [shape: f32[4,8,32], index: 1, kind: input, shape index: {}]   ;;  %s1313_s2 = inlined_call_operand.hbm [shape: f32[1,32], index: 2, kind: input, shape index: {}]   ;;  %s1314_s3 = inlined_call_operand.hbm [shape: f32[2,8,32], index: 3, kind: output, shape index: {}]  }
   0x1   :  { %1334 = sst [smem:[#allocation23_spill]] %s1313_s2 }
   0x2   :  { %1335 = sst [smem:[#allocation24_spill]] %s1314_s3 }
   0x3   :  { %8 = vsyncpa [#allocation4], 0 }
   0x4   :  { %10 = vsyncpa [#allocation4 + $0x1], 0 }
   0x5   :  { %11 = vsyncpa [#allocation7], 0 }
   0x6   :  { %13 = vsyncpa [#allocation7 + $0x1], 0 }
   0x7   :  { %14 = vsyncpa [#allocation5], 0 }
   0x8   :  { %16 = vsyncpa [#allocation5 + $0x1], 0  ;;  %s944_s12 = smov 0   ;;  %s946_s13 = smov 0  }
   0x9   :  { %s948_s14 = smov 0   ;;  %s950_s15 = smov 0  }
   0xa   :  { %s952_s16 = smov 0   ;;  %s954_s17 = smov 0  }
   0xb   :  { %s956_s18 = smov 0   ;;  %s958_s19 = smov 0  }
   0xc   :  { %s960_s20 = smov 0   ;;  %s962_s21 = smov 0  }
   0xd   :  { %s964_s22 = smov 0   ;;  %s966_s23 = smov 0  }
   0xe   :  { %s968_s24 = smov 0   ;;  %s970_s25 = smov 0  }
   0xf LB: > { %1336 = sst [smem:[#allocation14_spill]] %s863_s12  ;;  %s1011_s26 = sadd.s32 4294967295, %s915_s25   ;;  %s915_s25 = sphi %s970_s25, %s22_s25   ;;  %s911_s24 = sphi %s968_s24, %s1393_s24   ;;  %s907_s23 = sphi %s966_s23, %s1392_s23   ;;  %s903_s22 = sphi %s964_s22, %s1391_s22   ;;  %s899_s21 = sphi %s962_s21, %s1390_s21   ;;  %s895_s20 = sphi %s960_s20, %s1389_s20   ;;  %s891_s19 = sphi %s958_s19, %s1388_s19   ;;  %s887_s18 = sphi %s956_s18, %s1387_s18   ;;  %s883_s17 = sphi %s954_s17, %s1386_s17   ;;  %s879_s16 = sphi %s952_s16, %s1385_s16   ;;  %s875_s15 = sphi %s950_s15, %s1384_s15   ;;  %s871_s14 = sphi %s948_s14, %s1383_s14   ;;  %s867_s13 = sphi %s946_s13, %s1382_s13   ;;  %s863_s12 = sphi %s944_s12, %s1381_s12  }
  0x10   : > { %1337 = sst [smem:[#allocation15_spill]] %s867_s13  ;;  %s499_s27 = sadd.s32 4294967294, %s915_s25  }
  0x11   : > { %1338 = sst [smem:[#allocation16_spill]] %s899_s21  ;;  %p65_p0 = scmp.ne.s32.totalorder %s891_s19, %s887_s18 }
  0x12   : > { %1339 = sst [smem:[#allocation17_spill]] %s903_s22  ;;  %p1317_p1 = scmp.eq.s32.totalorder %s1011_s26, 0 }
  0x13   : > { %1340 = sst [smem:[#allocation18_spill]] %s1011_s26  ;;  %p91_p2 = scmp.ne.s32.totalorder %s879_s16, %s875_s15 }
  0x14   : > { %p1020_p3 = por %p1317_p1, %p65_p0  ;;  %p137_p4 = scmp.ne.s32.totalorder %s871_s14, %s867_s13 }
  0x15   : > { %p1028_p5 = por %p91_p2, %p1317_p1  ;;  %p138_p6 = scmp.eq.s32.totalorder %s1011_s26, 7 }
  0x16   : > { %s1341_s29 = scalar_select %p1020_p3, 1, 0 }
  0x17   : > { %s1342_s30 = scalar_select %p1028_p5, 1, 0 }
  0x18   : > { %p143_p7 = scmp.ne.s32.totalorder %s867_s13, %s863_s12  ;;  %p144_p8 = scmp.eq.s32.totalorder %s499_s27, 7 }
  0x19   : > { %1343 = sst [smem:[#allocation19_spill]] %s1342_s30  ;;  %p1035_p9 = por %p138_p6, %p137_p4 }
  0x1a   : > { %p500_p10 = scmp.ge.s32.totalorder %s915_s25, 1  ;;  %p1040_p11 = por %p144_p8, %p143_p7 }
  0x1b   : > { %s1344_s4 = scalar_select %p1035_p9, 1, 0 }
  0x1c   : > { %s1346_s5 = scalar_select %p1040_p11, 1, 0 }
  0x1d   : > { %1345 = sst [smem:[#allocation20_spill]] %s1344_s4  ;;  %p151_p12 = scmp.lt.s32.totalorder %s915_s25, 9 }
  0x1e   : > { %1347 = sst [smem:[#allocation21_spill]] %s1346_s5  ;;  %s917_s7 = smov [#allocation8]  }
  0x1f   : > { %p1045_p13 = pnand %p500_p10, %p151_p12  ;;  %s164_s8 = sshll.u32 %s917_s7, 4  ;;  %s165_s8 = int_to_ptr.vmem [resolvable:$true] %s164_s8 }
  0x20   : > { %s34_s10 = sadd.s32 1, %s907_s23  ;;  %s1350_s2 = sld [smem:[#allocation23_spill]] }
  0x21   : > { %s1348_s6 = scalar_select %p1045_p13, 1, 0 }
  0x22   : > { %p538_p0 = pneg %p1045_p13 }
  0x24   : > { %p1053_p2 = pnand %p538_p0, %p1317_p1 }
  0x26   : > { %s673_s18 = scalar_lea.hbm %s1350_s2, 16  ;;  %p675_p6 = pneg %p1053_p2 }
  0x27   : > { %p674_p4 = scmp.ne.s32.totalorder %s1350_s2, %s673_s18  ;;  %p680_p10 = scmp.lt.u32.totalorder %s673_s18, %s1350_s2 }
  0x29   : > { %p676_p7 = pnand %p675_p6, %p674_p4 }
  0x2b   : > { %p677_p8 = pneg %p676_p7 }
  0x2d   : > { %p682_p12 = pnand %p680_p10, %p677_p8 }
  0x2f   : > { %685 = shalt.err (!%p682_p12)
}
  0x30   : > { %s686_s12 = scalar_lea.vmem %s165_s8, 16  ;;  %s693_s11 = scalar_lea.vmem %s165_s8, 32 }
  0x31   : > { %p687_p0 = scmp.ne.s32.totalorder %s165_s8, %s686_s12  ;;  %p694_p9 = scmp.lt.s32.totalorder %s165_s8, %s165_s8 }
  0x32   : > { %p695_p5 = scmp.lt.s32.totalorder %s693_s11, %s686_s12 }
  0x33   : > { %p689_p1 = pnand %p687_p0, %p675_p6 }
  0x34   : > { %p696_p3 = por %p695_p5, %p694_p9 }
  0x35   : > { %p690_p11 = pneg %p689_p1 }
  0x37   : > { %p697_p13 = pnand %p696_p3, %p690_p11 }
  0x39   : > { %700 = shalt.err (!%p697_p13)
}
  0x3a   : > { %541 = dma.hbm_to_vmem [thread:$0]  (!%p1053_p2), %s1350_s2, 16, %s165_s8, [#allocation7]  }
  0x3b   : > { %p35_p1 = scmp.ge.s32.totalorder %s34_s10, 4  ;;  %s41_s12 = sadd.s32 1, %s911_s24 }
  0x3c   : > { %s52_s5 = sadd.s32 1, %s895_s20  ;;  %p59_p3 = scmp.ne.s32.totalorder %s895_s20, %s891_s19 }
  0x3d   : > { %s1395_s10 = smov (%p35_p1, %s34_s10), 0  ;;  %s1397_s12 = smov (!%p35_p1, %s41_s12), %s911_s24 }
  0x3e   : > { %1351 = sst [smem:[#allocation22_spill]] %s1395_s10  ;;  %s1083_s9 = ssub.s32 %s907_s23, %s1395_s10 }
  0x3f   : > { %p1333_p5 = scmp.eq.s32.totalorder %s915_s25, 0  ;;  %p43_p9 = scmp.ge.s32.totalorder %s1397_s12, 2 }
  0x40   : > { %p76_p11 = scmp.eq.s32.totalorder %s1083_s9, 0  ;;  %p1332_p2 = scmp.lt.s32.totalorder %s915_s25, 8 }
  0x41   : > { %p1089_p13 = por %p1333_p5, %p59_p3  ;;  %s1399_s12 = smov (%p43_p9, %s1397_s12), 0 }
  0x42   : > { %s175_s18 = sand.u32 1, %s895_s20   ;;  %s504_s27 = sshll.u32 %s911_s24, 2 }
  0x43   : > { %s45_s7 = ssub.s32 %s911_s24, %s1399_s12  ;;  %s503_s28 = sshll.u32 %s175_s18, 3 }
  0x44   : > { %s47_s11 = sor.u32 %s1083_s9, %s45_s7  ;;  %p125_p4 = scmp.eq.s32.totalorder %s45_s7, 0 }
  0x45   : > { %p50_p6 = scmp.eq.s32.totalorder %s47_s11, 0  ;;  %s1353_s15 = sadd.s32 1, %s871_s14 }
  0x46   : > { %s1104_s2 = scalar_select %p125_p4, %s871_s14, %s1353_s15  }
  0x47   : > { %s1107_s10 = scalar_select %p50_p6, %s895_s20, %s52_s5  }
  0x48   : > { %s185_s3 = sadd.s32 %s907_s23, %s504_s27  ;;  %s179_s22 = scalar_lea.vmem [#allocation3], %s503_s28 }
  0x49   : > { %s505_s4 = sshll.u32 %s185_s3, 7  ;;  %s189_s21 = sshll.u32 %s179_s22, 4  ;;  %s1115_s21 = int_to_ptr.vmem [resolvable:$true] %s189_s21 }
  0x4a   : > { %s1113_s26 = scalar_lea.hbm %s1311_s0, %s505_s4  ;;  %p1121_p7 = pnand %p1332_p2, %p1089_p13 }
  0x4b   : > { %s196_s3 = sand.u32 1, %s915_s25   ;;  %s78_s22 = sadd.s32 1, %s883_s17 }
  0x4c   : > { %s176_s27 = scalar_lea.sflag [#allocation4], %s175_s18  ;;  %s701_s13 = scalar_lea.hbm %s1113_s26, 128 }
  0x4d   : > { %p702_p8 = scmp.ne.s32.totalorder %s1113_s26, %s701_s13  ;;  %p703_p10 = pneg %p1121_p7 }
  0x4e   : > { %s706_s8 = scalar_lea.hbm %s1311_s0, 1024  ;;  %p707_p1 = scmp.lt.u32.totalorder %s1113_s26, %s1311_s0 }
  0x4f   : > { %p704_p12 = pnand %p703_p10, %p702_p8  ;;  %p708_p3 = scmp.lt.u32.totalorder %s706_s8, %s701_s13 }
  0x50   : > { %p710_p13 = scmp.lt.u32.totalorder %s701_s13, %s1113_s26 }
  0x51   : > { %p705_p0 = pneg %p704_p12  ;;  %p709_p9 = por %p708_p3, %p707_p1 }
  0x53   : > { %p711_p4 = por %p710_p13, %p709_p9 }
  0x55   : > { %p712_p6 = pnand %p711_p4, %p705_p0 }
  0x57   : > { %715 = shalt.err (!%p712_p6)
}
  0x58   : > { %s716_s18 = scalar_lea.vmem %s1115_s21, 128  ;;  %s918_s28 = smov [#allocation3]  }
  0x59   : > { %p717_p8 = scmp.ne.s32.totalorder %s1115_s21, %s716_s18  ;;  %s721_s15 = sshll.u32 %s918_s28, 4  ;;  %s722_s15 = int_to_ptr.vmem [resolvable:$false] %s721_s15 }
  0x5a   : > { %s723_s30 = scalar_lea.vmem %s722_s15, 256  ;;  %p724_p5 = scmp.lt.s32.totalorder %s1115_s21, %s722_s15 }
  0x5b   : > { %p719_p12 = pnand %p717_p8, %p703_p10  ;;  %p725_p1 = scmp.lt.s32.totalorder %s723_s30, %s716_s18 }
  0x5d   : > { %p720_p2 = pneg %p719_p12  ;;  %p726_p3 = por %p725_p1, %p724_p5 }
  0x5f   : > { %p727_p9 = pnand %p726_p3, %p720_p2 }
  0x61   : > { %730 = shalt.err (!%p727_p9)
}
  0x62   : > { %545 = dma.hbm_to_vmem [thread:$0]  (!%p1121_p7), %s1113_s26, 128, %s1115_s21, %s176_s27  }
  0x63   : > { %s1157_s13 = scalar_select %p76_p11, %s883_s17, %s78_s22  }
  0x64   : > { %p85_p5 = scmp.ne.s32.totalorder %s883_s17, %s879_s16  ;;  %s198_s4 = sand.u32 1, %s883_s17  }
  0x65   : > { %s507_s5 = sshll.u32 %s907_s23, 7  ;;  %p1355_p2 = scmp.eq.s32.totalorder %s915_s25, 0 }
  0x66   : > { %s506_s8 = sshll.u32 %s198_s4, 3  ;;  %s1168_s18 = scalar_lea.hbm %s1312_s1, %s507_s5 }
  0x67   : > { %p87_p10 = por %p85_p5, %p1355_p2  ;;  %s200_s21 = scalar_lea.vmem [#allocation6], %s506_s8 }
  0x68   : > { %s207_s26 = sshll.u32 %s200_s21, 4  ;;  %p1356_p7 = scmp.lt.s32.totalorder %s915_s25, 8  ;;  %s1176_s26 = int_to_ptr.vmem [resolvable:$true] %s207_s26 }
  0x69   : > { %s197_s22 = scalar_lea.sflag [#allocation7], %s196_s3  ;;  %s731_s27 = scalar_lea.hbm %s1168_s18, 128 }
  0x6a   : > { %p1172_p11 = pnand %p1356_p7, %p87_p10  ;;  %p732_p0 = scmp.ne.s32.totalorder %s1168_s18, %s731_s27 }
  0x6b   : > { %s736_s30 = scalar_lea.hbm %s1312_s1, 512  ;;  %p737_p8 = scmp.lt.u32.totalorder %s1168_s18, %s1312_s1 }
  0x6c   : > { %p733_p13 = pneg %p1172_p11  ;;  %p738_p12 = scmp.lt.u32.totalorder %s736_s30, %s731_s27 }
  0x6d   : > { %p740_p3 = scmp.lt.u32.totalorder %s731_s27, %s1168_s18 }
  0x6e   : > { %p734_p4 = pnand %p733_p13, %p732_p0  ;;  %p739_p1 = por %p738_p12, %p737_p8 }
  0x70   : > { %p735_p6 = pneg %p734_p4  ;;  %p741_p9 = por %p740_p3, %p739_p1 }
  0x72   : > { %p742_p5 = pnand %p741_p9, %p735_p6 }
  0x74   : > { %745 = shalt.err (!%p742_p5)
}
  0x75   : > { %s746_s3 = scalar_lea.vmem %s1176_s26, 128  ;;  %s919_s8 = smov [#allocation6]  }
  0x76   : > { %p747_p2 = scmp.ne.s32.totalorder %s1176_s26, %s746_s3  ;;  %s751_s7 = sshll.u32 %s919_s8, 4  ;;  %s752_s7 = int_to_ptr.vmem [resolvable:$false] %s751_s7 }
  0x77   : > { %s753_s11 = scalar_lea.vmem %s752_s7, 256  ;;  %p754_p0 = scmp.lt.s32.totalorder %s1176_s26, %s752_s7 }
  0x78   : > { %p749_p10 = pnand %p747_p2, %p733_p13  ;;  %p755_p4 = scmp.lt.s32.totalorder %s753_s11, %s746_s3 }
  0x7a   : > { %p750_p7 = pneg %p749_p10  ;;  %p756_p8 = por %p755_p4, %p754_p0 }
  0x7c   : > { %p757_p12 = pnand %p756_p8, %p750_p7 }
  0x7e   : > { %760 = shalt.err (!%p757_p12)
}
  0x7f   : > { %548 = dma.hbm_to_vmem [thread:$0]  (!%p1172_p11), %s1168_s18, 128, %s1176_s26, %s197_s22  }
  0x80   : > { %p1358_p6 = scmp.ne.s32.totalorder %s1348_s6, 0 }
  0x81   : > { %s218_s21 = sand.u32 (!%p1358_p6), 1, %s891_s19   ;;  %p1359_p13 = scmp.ne.s32.totalorder (!%p1358_p6), %s1341_s29, 0 }
  0x82   : > { %216 = sbr.rel (%p1358_p6) target bundleno = 420 (0x1a4), region = 32  ;;  %s509_s27 = sshll.u32 (!%p1358_p6), %s218_s21, 3 }
  0x83   : > { %s219_s28 = scalar_lea.sflag (!%p1358_p6), [#allocation4], %s218_s21  ;;  %s222_s15 = scalar_lea.vmem (!%p1358_p6), [#allocation3], %s509_s27 }
  0x89   : > { %846 = dma.done.wait (%p1359_p13), %s219_s28, 128  }
  0x8a   : > { %848 = vsyncadd (%p1359_p13), %s219_s28, 4294967168  ;;  %s1360_s30 = sld [smem:[#allocation18_spill]]  ;;  %s1361_s9 = sld [smem:[#allocation19_spill]] }
  0x8b   : > { %s229_s5 = sand.u32 1, %s879_s16  }
  0x8c   : > { %s510_s18 = sshll.u32 %s229_s5, 3 }
  0x8d   : > { %s231_s6 = scalar_lea.vmem [#allocation6], %s510_s18 }
  0x90   : > { %s227_s4 = sand.u32 1, %s1360_s30   ;;  %p1362_p11 = scmp.ne.s32.totalorder %s1361_s9, 0 }
  0x91   : > { %s228_s26 = scalar_lea.sflag [#allocation7], %s227_s4 }
  0x92   : > { %850 = dma.done.wait (%p1362_p11), %s228_s26, 128  }
  0x93   : > { %852 = vsyncadd (%p1362_p11), %s228_s26, 4294967168  ;;  %p1363_p1 = scmp.eq.s32.totalorder %s1360_s30, 0 }
  0x95   : > { %854 = dma.done.wait (%p1363_p1), [#allocation7], 16   ;;  %p1364_p3 = pmov %p1363_p1 }
  0x96   : > { %s1365_s29 = sld [smem:[#allocation15_spill]]  ;;  %s1366_s7 = sld [smem:[#allocation16_spill]] }
  0x97   : > { %856 = vsyncadd (%p1364_p3), [#allocation7], 4294967280 }
  0x9c   : > { %s260_s22 = sand.u32 1, %s1365_s29   ;;  %p513_p9 = scmp.ne.s32.totalorder %s1366_s7, 0 }
  0x9d   : > { %s1225_s3 = sshll.u32 %s260_s22, 3  ;;  %vm267_vm0 = vcmask (!%p513_p9), 261120   ;;  %v920_v0 = vmov (!%p513_p9), 0.0  }
  0x9e   : > { %s262_s8 = scalar_lea.vmem [#allocation9], %s1225_s3  ;;  %266 = sbr.rel (%p513_p9) target bundleno = 165 (0xa5), region = 48  ;;  %268 = vst.msk [vmem:[#allocation2] sm:$0xff] (!%p513_p9), %vm267_vm0, %v920_v0 }
  0xa5 PF: > { %v271_v1 = vld [vmem:[%s231_s6] sm:$0xff]  ;;  %v270_v2 = vld [vmem:[%s222_s15] sm:$0xff]  ;;  %vm272_vm1 = vcmask 64512   ;;  %v921_v3 = vmov 0.0   ;;  %vm922_vm2 = vmmov 0   ;;  %vm347_vm3 = vcmask 261120  }
  0xa6   : > { %523 = vmatprep.subr.mxu0 %v921_v3  ;;  %525 = vmatprep.mubr.msk.f32.mxu0 %vm922_vm2, %v921_v3  ;;  %v269_v4 = vld [vmem:[#allocation2] sm:$0xff]  ;;  %s1367_s11 = sld [smem:[#allocation16_spill]] }
  0xa7   : > { %524 = vmatpush3.msra.mxu0 %v271_v1 }
  0xa8   : > { %526 = vmatmul.mubr.msk.f32.vlgmr.msra.gmra.mrb[0].mxu0 %vm272_vm1, %v270_v2 }
  0xac   : > { %p515_p5 = scmp.ne.s32.totalorder %s1367_s11, 3 }
  0xad   : > { %v516_v9 = vld [vmem:[#allocation8] ss:$0 sm:$0xff] (!%p515_p5) }
 0x178   : > { %352 = sbr.rel (%p515_p5) target bundleno = 393 (0x189), region = 52 }
 0x17b   : > { %v342_v5 = vpop.f32.mrb[0].mxu0 }
 0x17c   : > { %v346_v6 = vadd.f32 %v342_v5, %v269_v4  ;;  %v527_v7 = vpop.f32.mrb[1].mxu0 }
 0x17e   : > { %348 = vst.msk [vmem:[#allocation2] sm:$0xff] %vm347_vm3, %v346_v6 }
 0x185   : > { %v353_v8 = vld [vmem:[#allocation2] sm:$0xff] }
 0x186   : > { %v361_v10 = vadd.f32 %v516_v9, %v353_v8 }
 0x188   : > { %362 = vst.msk [vmem:[%s262_s8] sm:$0xff] %vm347_vm3, %v361_v10 }
 0x189 PF: > { %s1368_s21 = sld [smem:[#allocation17_spill]]  ;;  %s1370_s28 = sld [smem:[#allocation20_spill]] }
 0x18a   : > { %s1371_s4 = sld [smem:[#allocation24_spill]]  ;;  %s378_s18 = sshll.u32 %s262_s8, 4  ;;  %s379_s18 = int_to_ptr.vmem [resolvable:$true] %s378_s18 }
 0x18b   : > { %s364_s26 = scalar_lea.sflag [#allocation5], %s260_s22  ;;  %s761_s6 = scalar_lea.vmem %s379_s18, 128 }
 0x18c   : > { %p762_p2 = scmp.ne.s32.totalorder %s379_s18, %s761_s6  ;;  %s923_s29 = smov [#allocation9]  }
 0x18d   : > { %s765_s7 = sshll.u32 %s923_s29, 4  ;;  %s766_s7 = int_to_ptr.vmem [resolvable:$false] %s765_s7 }
 0x18e   : > { %s767_s11 = scalar_lea.vmem %s766_s7, 256  ;;  %p768_p4 = scmp.lt.s32.totalorder %s379_s18, %s766_s7 }
 0x18f   : > { %s518_s15 = sshll.u32 %s1368_s21, 7  ;;  %p1372_p10 = scmp.ne.s32.totalorder %s1370_s28, 0 }
 0x190   : > { %s1236_s5 = scalar_lea.hbm %s1371_s4, %s518_s15  ;;  %p769_p8 = scmp.lt.s32.totalorder %s767_s11, %s761_s6 }
 0x191   : > { %p763_p7 = pnand %p762_p2, %p1372_p10 }
 0x192   : > { %p770_p12 = por %p769_p8, %p768_p4 }
 0x193   : > { %p764_p0 = pneg %p763_p7 }
 0x195   : > { %p771_p6 = pnand %p770_p12, %p764_p0 }
 0x197   : > { %774 = shalt.err (!%p771_p6)
}
 0x198   : > { %s775_s22 = scalar_lea.hbm %s1236_s5, 128  ;;  %s779_s21 = scalar_lea.hbm %s1371_s4, 256 }
 0x199   : > { %p776_p13 = scmp.ne.s32.totalorder %s1236_s5, %s775_s22  ;;  %p780_p3 = scmp.lt.u32.totalorder %s1236_s5, %s1371_s4 }
 0x19a   : > { %p781_p9 = scmp.lt.u32.totalorder %s779_s21, %s775_s22  ;;  %p783_p2 = scmp.lt.u32.totalorder %s775_s22, %s1236_s5 }
 0x19b   : > { %p777_p11 = pnand %p776_p13, %p1372_p10 }
 0x19c   : > { %p782_p5 = por %p781_p9, %p780_p3 }
 0x19d   : > { %p778_p1 = pneg %p777_p11 }
 0x19e   : > { %p784_p7 = por %p783_p2, %p782_p5 }
 0x1a0   : > { %p785_p0 = pnand %p784_p7, %p778_p1 }
 0x1a2   : > { %788 = shalt.err (!%p785_p0)
}
 0x1a3   : > { %536 = dma.vmem_to_hbm [thread:$0]  (%p1372_p10), %s379_s18, 128, %s1236_s5, %s364_s26  }
 0x1a4 PF: > { %s1373_s30 = sld [smem:[#allocation14_spill]]  ;;  %s1374_s9 = sld [smem:[#allocation21_spill]] }
 0x1a5   : > { %p556_p4 = scmp.ge.s32.totalorder %s915_s25, 2 }
 0x1aa   : > { %s390_s6 = sand.u32 1, %s1373_s30   ;;  %p1375_p8 = scmp.ne.s32.totalorder %s1374_s9, 0 }
 0x1ab   : > { %s391_s29 = scalar_lea.sflag [#allocation5], %s390_s6 }
 0x1ac   : > { %p550_p12 = pnand %p556_p4, %p1375_p8 }
 0x1ae   : > { %858 = dma.done.wait (!%p550_p12), %s391_s29, 128  }
 0x1af   : > { %860 = vsyncadd (!%p550_p12), %s391_s29, 4294967168  ;;  %s22_s25 = sadd.s32 1, %s915_s25   ;;  %s1377_s28 = sld [smem:[#allocation15_spill]] }
 0x1b0   : > { %p1264_p6 = scmp.ge.s32.totalorder %s22_s25, 10   ;;  %s1378_s5 = smov %s1157_s13 }
 0x1b1   : > { %s1379_s26 = sld [smem:[#allocation22_spill]]  ;;  %s1380_s11 = smov %s1399_s12 }
 0x1b2   : > { %s1382_s13 = smov %s871_s14  ;;  %s1383_s14 = smov %s1104_s2 }
 0x1b3   : > { %s1384_s15 = smov %s879_s16  ;;  %s1385_s16 = smov %s883_s17 }
 0x1b4   : > { %s1386_s17 = smov %s1378_s5  ;;  %s1387_s18 = smov %s891_s19 }
 0x1b5   : > { %s1381_s12 = smov %s1377_s28  ;;  %s1388_s19 = smov %s895_s20 }
 0x1b6   : > { %s1389_s20 = smov %s1107_s10  ;;  %s1390_s21 = smov %s907_s23 }
 0x1b7   : > { %s1391_s22 = smov %s911_s24  ;;  %s1392_s23 = smov %s1379_s26 }
 0x1b8   : > { %s1393_s24 = smov %s1380_s11  ;;  %21 = sbr.rel (!%p1264_p6) target bundleno = 15 (0xf), region = 102 }
 0x1bf   :  { %396 = vsyncpa [#allocation4], 1 }
 0x1c0   :  { %398 = vsyncpa [#allocation4 + $0x1], 1 }
 0x1c1   :  { %399 = vsyncpa [#allocation7], 1 }
 0x1c2   :  { %401 = vsyncpa [#allocation7 + $0x1], 1 }
 0x1c3   :  { %402 = vsyncpa [#allocation5], 1 }
 0x1c4   :  { %404 = vsyncpa [#allocation5 + $0x1], 1 }

</bundles_post_ra>
